<compile_context>
chip_gen: v6e
topology: v6e:2x2x1
jax: 0.10.0
libtpu: 0.0.40
codegen_flags: <defaults>
</compile_context>

<pallas_src>
import functools

import jax
import jax.numpy as jnp
from jax.experimental import pallas as pl
from jax.experimental.pallas import tpu as pltpu

LANE = 128


def mlp_kernel(x_ref, w1_ref, b1_ref, w2_ref, b2_ref, w3_ref, b3_ref, o_ref):
    """Fused 3-layer MLP, ReLU between layers, no activation on last layer.

    Rows of the batch tile are fully independent (required: the last tile may
    read unspecified out-of-bounds rows when B % block_b != 0; their output
    stores are masked).
    """
    # In-register cast of the streaming input to the MXU compute dtype.
    x = x_ref[...].astype(w1_ref.dtype)

    # Layer 1: Linear + ReLU (f32 accumulate, f32 bias)
    h = jnp.dot(x, w1_ref[...], preferred_element_type=jnp.float32) + b1_ref[...]
    h = jnp.maximum(h, 0.0)

    # Layer 2: Linear + ReLU
    h = jnp.dot(h.astype(w2_ref.dtype), w2_ref[...],
                preferred_element_type=jnp.float32) + b2_ref[...]
    h = jnp.maximum(h, 0.0)

    # Layer 3: Linear (activate_last_layer=False -> no activation)
    y = jnp.dot(h.astype(w3_ref.dtype), w3_ref[...],
                preferred_element_type=jnp.float32) + b3_ref[...]
    o_ref[...] = y.astype(o_ref.dtype)


def _round_up(n, m):
    return ((n + m - 1) // m) * m


def _pad2(a, shape):
    """Zero-pad a 2-D array up to `shape`."""
    return jnp.pad(a, ((0, shape[0] - a.shape[0]), (0, shape[1] - a.shape[1])))


def _device_info():
    """(physical VMEM bytes, #TensorCores sharing the grid). Conservative defaults."""
    vmem_cap = 64 * 1024 * 1024  # v7x per-TC VMEM: the smallest across generations
    try:
        vmem_cap = int(pltpu.get_tpu_info().vmem_capacity_bytes)
    except Exception:
        pass
    num_cores = 1
    try:
        dev = jax.devices()[0]
        n = getattr(dev, "num_cores", None)
        if isinstance(n, int) and n > 0:
            num_cores = n
        else:
            kind = str(getattr(dev, "device_kind", "")).lower()
            # megacore (v4/v5p) and v7x expose 2 TCs to 'parallel' grid sharding
            if any(t in kind for t in ("v4", "v5p", "v7")):
                num_cores = 2
    except Exception:
        pass
    return vmem_cap, num_cores


def _choose_block_b(B, per_row_bytes, fixed_bytes, vmem_budget, num_cores):
    """Largest batch tile that fits the VMEM budget; split only for multi-TC chips."""
    b_pad = _round_up(max(B, 8), 8)
    bb = b_pad
    if num_cores > 1 and b_pad >= 16:
        # give every TensorCore at least one batch tile
        bb = _round_up(pl.cdiv(b_pad, num_cores), 8)
    while bb > 8 and fixed_bytes + bb * per_row_bytes > vmem_budget:
        bb = _round_up(pl.cdiv(bb, 2), 8)
    return min(bb, 1024)


def prepare_params(w1, b1, w2, b2, w3, b3, compute_dtype=jnp.bfloat16):
    """One-time parameter preparation (call once; keep the result around).

    Pads the hidden feature dims to lane multiples (exact: zero pads) and casts
    weights to the MXU compute dtype. D_in and D_out are left unpadded so the
    per-call streaming input/output carry no padding. Biases stay f32.
    """
    d_in, d_h1 = w1.shape
    d_h2 = w2.shape[1]
    d_out = w3.shape[1]
    h1p = _round_up(d_h1, LANE)
    h2p = _round_up(d_h2, LANE)

    w1p = _pad2(w1, (d_in, h1p)).astype(compute_dtype)
    b1p = _pad2(b1.reshape(1, -1), (1, h1p)).astype(jnp.float32)
    w2p = _pad2(w2, (h1p, h2p)).astype(compute_dtype)
    b2p = _pad2(b2.reshape(1, -1), (1, h2p)).astype(jnp.float32)
    w3p = _pad2(w3, (h2p, d_out)).astype(compute_dtype)
    b3p = b3.reshape(1, -1).astype(jnp.float32)
    return (w1p, b1p, w2p, b2p, w3p, b3p)


@functools.partial(jax.jit, static_argnames=("single_buffer_weights",))
def mlp_forward(x, params, single_buffer_weights=True):
    w1p, b1p, w2p, b2p, w3p, b3p = params
    B, D_in = x.shape
    assert w1p.shape[0] == D_in, (w1p.shape, D_in)
    D_out = w3p.shape[1]
    max_hidden = max(w1p.shape[1], w2p.shape[1])

    vmem_cap, num_cores = _device_info()
    vmem_budget = int(0.75 * vmem_cap)

    # Bytes resident in VMEM independent of the batch tile (weights + biases).
    wbuf = 1 if single_buffer_weights else 2
    fixed_bytes = wbuf * sum(int(a.size) * a.dtype.itemsize
                             for a in (w1p, b1p, w2p, b2p, w3p, b3p))
    if fixed_bytes > vmem_budget:
        # TODO(synk): hidden-dim-tiled fallback (grid axis 'arbitrary' + f32
        # accumulator scratch) for weights that do not fit VMEM.
        raise NotImplementedError("MLP weights do not fit in VMEM on this chip")

    # Per-batch-row bytes: double-buffered x / out tiles + ~2 live f32
    # intermediates of width max_hidden.
    per_row_bytes = (2 * (D_in * x.dtype.itemsize + D_out * x.dtype.itemsize)
                     + 2 * max_hidden * 4)

    bb = _choose_block_b(B, per_row_bytes, fixed_bytes, vmem_budget, num_cores)
    grid = (pl.cdiv(B, bb),)
    needed = fixed_bytes + bb * per_row_bytes
    vmem_limit = int(min(vmem_budget, max(2 * needed, 32 * 1024 * 1024)))

    # Grid-invariant (constant index_map) operands: fetched once, reused across
    # all batch tiles; single-buffer them to halve resident-weight VMEM.
    def full_spec(arr):
        if single_buffer_weights:
            return pl.BlockSpec(arr.shape, lambda i: (0, 0),
                                pipeline_mode=pl.Buffered(1))
        return pl.BlockSpec(arr.shape, lambda i: (0, 0))

    return pl.pallas_call(
        mlp_kernel,
        out_shape=jax.ShapeDtypeStruct((B, D_out), x.dtype),
        grid_spec=pltpu.PrefetchScalarGridSpec(
            num_scalar_prefetch=0,
            grid=grid,
            in_specs=[
                # x streams over the batch, unpadded (D_in == full minor dim).
                pl.BlockSpec((bb, D_in), lambda i: (i, 0)),
                full_spec(w1p), full_spec(b1p),
                full_spec(w2p), full_spec(b2p),
                full_spec(w3p), full_spec(b3p),
            ],
            # Output written directly at (B, D_out): no wrapper slice.
            out_specs=pl.BlockSpec((bb, D_out), lambda i: (i, 0)),
        ),
        compiler_params=pltpu.CompilerParams(
            dimension_semantics=("parallel",),
            vmem_limit_bytes=vmem_limit,
        ),
    )(x, w1p, b1p, w2p, b2p, w3p, b3p)


def run_forward(x, params):
    """Call the kernel; fall back to double-buffered weight specs if the
    installed jax rejects pipeline_mode=pl.Buffered(1)."""
    try:
        return jax.block_until_ready(
            mlp_forward(x, params, single_buffer_weights=True))
    except Exception:
        return jax.block_until_ready(
            mlp_forward(x, params, single_buffer_weights=False))


def init_linear_params(key, in_dim, out_dim):
    """torch.nn.Linear re-initialized with MLPInits.relu (kaiming_normal_,
    fan_in, nonlinearity='relu' -> std = sqrt(2/fan_in)); bias keeps the torch
    default init uniform(-1/sqrt(fan_in), 1/sqrt(fan_in)).
    Returned weight is already transposed to (in_dim, out_dim)."""
    kw, kb = jax.random.split(key)
    std = (2.0 / in_dim) ** 0.5
    w = std * jax.random.normal(kw, (in_dim, out_dim), dtype=jnp.float32)
    bound = 1.0 / (in_dim ** 0.5)
    b = jax.random.uniform(kb, (1, out_dim), dtype=jnp.float32,
                           minval=-bound, maxval=bound)
    return w, b


def mlp_reference(x, w1, b1, w2, b2, w3, b3, compute_dtype=jnp.float32):
    cd = compute_dtype
    h = jnp.dot(x.astype(cd), w1.astype(cd),
                preferred_element_type=jnp.float32) + b1
    h = jnp.maximum(h, 0.0)
    h = jnp.dot(h.astype(cd), w2.astype(cd),
                preferred_element_type=jnp.float32) + b2
    h = jnp.maximum(h, 0.0)
    return jnp.dot(h.astype(cd), w3.astype(cd),
                   preferred_element_type=jnp.float32) + b3


if __name__ == "__main__":
    # MLP(input_dim=16, output_dim=8, hidden_dim=32, layers=3,
    #     activation_scheme='relu', activate_last_layer=False)
    B, D_in, D_hid, D_out = 256, 16, 32, 8

    key = jax.random.PRNGKey(0)
    kx, k1, k2, k3 = jax.random.split(key, 4)

    x = jax.random.normal(kx, (B, D_in), dtype=jnp.float32)
    w1, b1 = init_linear_params(k1, D_in, D_hid)
    w2, b2 = init_linear_params(k2, D_hid, D_hid)
    w3, b3 = init_linear_params(k3, D_hid, D_out)

    # One-time parameter preparation (hoisted out of the per-call hot path).
    params_bf16 = prepare_params(w1, b1, w2, b2, w3, b3,
                                 compute_dtype=jnp.bfloat16)
    params_f32 = prepare_params(w1, b1, w2, b2, w3, b3,
                                compute_dtype=jnp.float32)

    # 1) Exact f32 path: matches the PyTorch module's forward semantics.
    y_f32 = run_forward(x, params_f32)
    y_ref_f32 = mlp_reference(x, w1, b1, w2, b2, w3, b3,
                              compute_dtype=jnp.float32)
    assert y_f32.shape == (B, D_out), y_f32.shape
    assert jnp.allclose(y_f32, y_ref_f32, atol=1e-5, rtol=1e-5), \
        "f32 kernel mismatch vs reference"

    # 2) Default fast path: bf16 operands, f32 accumulation (v6e/v7x MXU peak).
    y_bf16 = run_forward(x, params_bf16)
    y_ref_bf16 = mlp_reference(x, w1, b1, w2, b2, w3, b3,
                               compute_dtype=jnp.bfloat16)
    assert y_bf16.shape == (B, D_out), y_bf16.shape
    assert jnp.allclose(y_bf16, y_ref_bf16, atol=2e-2, rtol=2e-2), \
        "bf16 kernel mismatch vs bf16 reference"

    print("KERNEL_OK")
</pallas_src>

<mosaic_0001>
module attributes {stable_mosaic.version = 11 : i64} {
  func.func @mlp_kernel(%arg0: i32, %arg1: memref<256x16xf32, #tpu.memory_space<vmem>>, %arg2: memref<16x128xf32, #tpu.memory_space<vmem>>, %arg3: memref<1x128xf32, #tpu.memory_space<vmem>>, %arg4: memref<128x128xf32, #tpu.memory_space<vmem>>, %arg5: memref<1x128xf32, #tpu.memory_space<vmem>>, %arg6: memref<128x8xf32, #tpu.memory_space<vmem>>, %arg7: memref<1x8xf32, #tpu.memory_space<vmem>>, %arg8: memref<256x8xf32, #tpu.memory_space<vmem>>) attributes {dimension_semantics = [#tpu.dimension_semantics<parallel>], iteration_bounds = array<i64: 1>, scalar_prefetch = 0 : i64, scratch_operands = 0 : i64, tpu.core_type = #tpu.core_type<tc>, window_params = [{transform_indices = @transform_0, window_bounds = array<i64: 256, 16>}, {pipeline_mode = #tpu.pipeline_mode<synchronous>, transform_indices = @transform_1, window_bounds = array<i64: 16, 128>}, {pipeline_mode = #tpu.pipeline_mode<synchronous>, transform_indices = @transform_2, window_bounds = array<i64: 1, 128>}, {pipeline_mode = #tpu.pipeline_mode<synchronous>, transform_indices = @transform_3, window_bounds = array<i64: 128, 128>}, {pipeline_mode = #tpu.pipeline_mode<synchronous>, transform_indices = @transform_4, window_bounds = array<i64: 1, 128>}, {pipeline_mode = #tpu.pipeline_mode<synchronous>, transform_indices = @transform_5, window_bounds = array<i64: 128, 8>}, {pipeline_mode = #tpu.pipeline_mode<synchronous>, transform_indices = @transform_6, window_bounds = array<i64: 1, 8>}, {transform_indices = @transform_7, window_bounds = array<i64: 256, 8>}]} {
    %c0 = arith.constant 0 : index
    %c0_0 = arith.constant 0 : index
    %0 = vector.load %arg1[%c0, %c0_0] : memref<256x16xf32, #tpu.memory_space<vmem>>, vector<256x16xf32>
    %c0_1 = arith.constant 0 : index
    %c0_2 = arith.constant 0 : index
    %1 = vector.load %arg2[%c0_1, %c0_2] : memref<16x128xf32, #tpu.memory_space<vmem>>, vector<16x128xf32>
    %cst = arith.constant dense<0.000000e+00> : vector<256x128xf32>
    %2 = tpu.matmul %0, %1, %cst {dimension_numbers = #tpu.dot_dimension_numbers<[1], [0], [0], [1], [0, 0, 1, 1], [], []>} : vector<256x16xf32>, vector<16x128xf32>, vector<256x128xf32> -> vector<256x128xf32>
    %c0_3 = arith.constant 0 : index
    %c0_4 = arith.constant 0 : index
    %3 = vector.load %arg3[%c0_3, %c0_4] : memref<1x128xf32, #tpu.memory_space<vmem>>, vector<1x128xf32>
    %4 = vector.broadcast %3 : vector<1x128xf32> to vector<256x128xf32>
    %5 = arith.addf %2, %4 : vector<256x128xf32>
    %cst_5 = arith.constant 0.000000e+00 : f32
    %6 = vector.broadcast %cst_5 : f32 to vector<256x128xf32>
    %7 = arith.maximumf %5, %6 : vector<256x128xf32>
    %c0_6 = arith.constant 0 : index
    %c0_7 = arith.constant 0 : index
    %8 = vector.load %arg4[%c0_6, %c0_7] : memref<128x128xf32, #tpu.memory_space<vmem>>, vector<128x128xf32>
    %cst_8 = arith.constant dense<0.000000e+00> : vector<256x128xf32>
    %9 = tpu.matmul %7, %8, %cst_8 {dimension_numbers = #tpu.dot_dimension_numbers<[1], [0], [0], [1], [0, 0, 1, 1], [], []>} : vector<256x128xf32>, vector<128x128xf32>, vector<256x128xf32> -> vector<256x128xf32>
    %c0_9 = arith.constant 0 : index
    %c0_10 = arith.constant 0 : index
    %10 = vector.load %arg5[%c0_9, %c0_10] : memref<1x128xf32, #tpu.memory_space<vmem>>, vector<1x128xf32>
    %11 = vector.broadcast %10 : vector<1x128xf32> to vector<256x128xf32>
    %12 = arith.addf %9, %11 : vector<256x128xf32>
    %cst_11 = arith.constant 0.000000e+00 : f32
    %13 = vector.broadcast %cst_11 : f32 to vector<256x128xf32>
    %14 = arith.maximumf %12, %13 : vector<256x128xf32>
    %c0_12 = arith.constant 0 : index
    %c0_13 = arith.constant 0 : index
    %15 = vector.load %arg6[%c0_12, %c0_13] : memref<128x8xf32, #tpu.memory_space<vmem>>, vector<128x8xf32>
    %cst_14 = arith.constant dense<0.000000e+00> : vector<256x8xf32>
    %16 = tpu.matmul %14, %15, %cst_14 {dimension_numbers = #tpu.dot_dimension_numbers<[1], [0], [0], [1], [0, 0, 1, 1], [], []>} : vector<256x128xf32>, vector<128x8xf32>, vector<256x8xf32> -> vector<256x8xf32>
    %c0_15 = arith.constant 0 : index
    %c0_16 = arith.constant 0 : index
    %17 = vector.load %arg7[%c0_15, %c0_16] : memref<1x8xf32, #tpu.memory_space<vmem>>, vector<1x8xf32>
    %18 = vector.broadcast %17 : vector<1x8xf32> to vector<256x8xf32>
    %19 = arith.addf %16, %18 : vector<256x8xf32>
    %c0_17 = arith.constant 0 : index
    %c0_18 = arith.constant 0 : index
    %20 = vector.load %arg8[%c0_17, %c0_18] : memref<256x8xf32, #tpu.memory_space<vmem>>, vector<256x8xf32>
    tpu.vector_store %arg8[%c0_17, %c0_18], %19 {strides = array<i32>} : memref<256x8xf32, #tpu.memory_space<vmem>>, vector<256x8xf32>,
    return
  }
  func.func @transform_0(%arg0: i32) -> (i32, i32) {
    %c0_i32 = arith.constant 0 : i32
    %c0_i32_0 = arith.constant 0 : i32
    return %arg0, %c0_i32 : i32, i32
  }
  func.func @transform_1(%arg0: i32) -> (i32, i32) {
    %c0_i32 = arith.constant 0 : i32
    %c0_i32_0 = arith.constant 0 : i32
    %c0_i32_1 = arith.constant 0 : i32
    return %c0_i32, %c0_i32_0 : i32, i32
  }
  func.func @transform_2(%arg0: i32) -> (i32, i32) {
    %c0_i32 = arith.constant 0 : i32
    %c0_i32_0 = arith.constant 0 : i32
    %c0_i32_1 = arith.constant 0 : i32
    return %c0_i32, %c0_i32_0 : i32, i32
  }
  func.func @transform_3(%arg0: i32) -> (i32, i32) {
    %c0_i32 = arith.constant 0 : i32
    %c0_i32_0 = arith.constant 0 : i32
    %c0_i32_1 = arith.constant 0 : i32
    return %c0_i32, %c0_i32_0 : i32, i32
  }
  func.func @transform_4(%arg0: i32) -> (i32, i32) {
    %c0_i32 = arith.constant 0 : i32
    %c0_i32_0 = arith.constant 0 : i32
    %c0_i32_1 = arith.constant 0 : i32
    return %c0_i32, %c0_i32_0 : i32, i32
  }
  func.func @transform_5(%arg0: i32) -> (i32, i32) {
    %c0_i32 = arith.constant 0 : i32
    %c0_i32_0 = arith.constant 0 : i32
    %c0_i32_1 = arith.constant 0 : i32
    return %c0_i32, %c0_i32_0 : i32, i32
  }
  func.func @transform_6(%arg0: i32) -> (i32, i32) {
    %c0_i32 = arith.constant 0 : i32
    %c0_i32_0 = arith.constant 0 : i32
    %c0_i32_1 = arith.constant 0 : i32
    return %c0_i32, %c0_i32_0 : i32, i32
  }
  func.func @transform_7(%arg0: i32) -> (i32, i32) {
    %c0_i32 = arith.constant 0 : i32
    %c0_i32_0 = arith.constant 0 : i32
    return %arg0, %c0_i32 : i32, i32
  }
}

module attributes {stable_mosaic.version = 11 : i64} {
  func.func @mlp_kernel(%arg0: i32, %arg1: memref<256x16xf32, #tpu.memory_space<vmem>>, %arg2: memref<16x128xf32, #tpu.memory_space<vmem>>, %arg3: memref<1x128xf32, #tpu.memory_space<vmem>>, %arg4: memref<128x128xf32, #tpu.memory_space<vmem>>, %arg5: memref<1x128xf32, #tpu.memory_space<vmem>>, %arg6: memref<128x8xf32, #tpu.memory_space<vmem>>, %arg7: memref<1x8xf32, #tpu.memory_space<vmem>>, %arg8: memref<256x8xf32, #tpu.memory_space<vmem>>) attributes {dimension_semantics = [#tpu.dimension_semantics<parallel>], iteration_bounds = array<i64: 1>, scalar_prefetch = 0 : i64, scratch_operands = 0 : i64, tpu.core_type = #tpu.core_type<tc>, window_params = [{transform_indices = @transform_0, window_bounds = array<i64: 256, 16>}, {pipeline_mode = #tpu.pipeline_mode<synchronous>, transform_indices = @transform_1, window_bounds = array<i64: 16, 128>}, {pipeline_mode = #tpu.pipeline_mode<synchronous>, transform_indices = @transform_2, window_bounds = array<i64: 1, 128>}, {pipeline_mode = #tpu.pipeline_mode<synchronous>, transform_indices = @transform_3, window_bounds = array<i64: 128, 128>}, {pipeline_mode = #tpu.pipeline_mode<synchronous>, transform_indices = @transform_4, window_bounds = array<i64: 1, 128>}, {pipeline_mode = #tpu.pipeline_mode<synchronous>, transform_indices = @transform_5, window_bounds = array<i64: 128, 8>}, {pipeline_mode = #tpu.pipeline_mode<synchronous>, transform_indices = @transform_6, window_bounds = array<i64: 1, 8>}, {transform_indices = @transform_7, window_bounds = array<i64: 256, 8>}]} {
    %c0 = arith.constant 0 : index
    %c0_0 = arith.constant 0 : index
    %0 = vector.load %arg1[%c0, %c0_0] : memref<256x16xf32, #tpu.memory_space<vmem>>, vector<256x16xf32>
    %c0_1 = arith.constant 0 : index
    %c0_2 = arith.constant 0 : index
    %1 = vector.load %arg2[%c0_1, %c0_2] : memref<16x128xf32, #tpu.memory_space<vmem>>, vector<16x128xf32>
    %cst = arith.constant dense<0.000000e+00> : vector<256x128xf32>
    %2 = tpu.matmul %0, %1, %cst {dimension_numbers = #tpu.dot_dimension_numbers<[1], [0], [0], [1], [0, 0, 1, 1], [], []>} : vector<256x16xf32>, vector<16x128xf32>, vector<256x128xf32> -> vector<256x128xf32>
    %c0_3 = arith.constant 0 : index
    %c0_4 = arith.constant 0 : index
    %3 = vector.load %arg3[%c0_3, %c0_4] : memref<1x128xf32, #tpu.memory_space<vmem>>, vector<1x128xf32>
    %4 = vector.broadcast %3 : vector<1x128xf32> to vector<256x128xf32>
    %5 = arith.addf %2, %4 : vector<256x128xf32>
    %cst_5 = arith.constant 0.000000e+00 : f32
    %6 = vector.broadcast %cst_5 : f32 to vector<256x128xf32>
    %7 = arith.maximumf %5, %6 : vector<256x128xf32>
    %c0_6 = arith.constant 0 : index
    %c0_7 = arith.constant 0 : index
    %8 = vector.load %arg4[%c0_6, %c0_7] : memref<128x128xf32, #tpu.memory_space<vmem>>, vector<128x128xf32>
    %cst_8 = arith.constant dense<0.000000e+00> : vector<256x128xf32>
    %9 = tpu.matmul %7, %8, %cst_8 {dimension_numbers = #tpu.dot_dimension_numbers<[1], [0], [0], [1], [0, 0, 1, 1], [], []>} : vector<256x128xf32>, vector<128x128xf32>, vector<256x128xf32> -> vector<256x128xf32>
    %c0_9 = arith.constant 0 : index
    %c0_10 = arith.constant 0 : index
    %10 = vector.load %arg5[%c0_9, %c0_10] : memref<1x128xf32, #tpu.memory_space<vmem>>, vector<1x128xf32>
    %11 = vector.broadcast %10 : vector<1x128xf32> to vector<256x128xf32>
    %12 = arith.addf %9, %11 : vector<256x128xf32>
    %cst_11 = arith.constant 0.000000e+00 : f32
    %13 = vector.broadcast %cst_11 : f32 to vector<256x128xf32>
    %14 = arith.maximumf %12, %13 : vector<256x128xf32>
    %c0_12 = arith.constant 0 : index
    %c0_13 = arith.constant 0 : index
    %15 = vector.load %arg6[%c0_12, %c0_13] : memref<128x8xf32, #tpu.memory_space<vmem>>, vector<128x8xf32>
    %cst_14 = arith.constant dense<0.000000e+00> : vector<256x8xf32>
    %16 = tpu.matmul %14, %15, %cst_14 {dimension_numbers = #tpu.dot_dimension_numbers<[1], [0], [0], [1], [0, 0, 1, 1], [], []>} : vector<256x128xf32>, vector<128x8xf32>, vector<256x8xf32> -> vector<256x8xf32>
    %c0_15 = arith.constant 0 : index
    %c0_16 = arith.constant 0 : index
    %17 = vector.load %arg7[%c0_15, %c0_16] : memref<1x8xf32, #tpu.memory_space<vmem>>, vector<1x8xf32>
    %18 = vector.broadcast %17 : vector<1x8xf32> to vector<256x8xf32>
    %19 = arith.addf %16, %18 : vector<256x8xf32>
    %c0_17 = arith.constant 0 : index
    %c0_18 = arith.constant 0 : index
    %20 = vector.load %arg8[%c0_17, %c0_18] : memref<256x8xf32, #tpu.memory_space<vmem>>, vector<256x8xf32>
    tpu.vector_store %arg8[%c0_17, %c0_18], %19 {strides = array<i32>} : memref<256x8xf32, #tpu.memory_space<vmem>>, vector<256x8xf32>,
    return
  }
  func.func @transform_0(%arg0: i32) -> (i32, i32) {
    %c0_i32 = arith.constant 0 : i32
    %c0_i32_0 = arith.constant 0 : i32
    return %arg0, %c0_i32 : i32, i32
  }
  func.func @transform_1(%arg0: i32) -> (i32, i32) {
    %c0_i32 = arith.constant 0 : i32
    %c0_i32_0 = arith.constant 0 : i32
    %c0_i32_1 = arith.constant 0 : i32
    return %c0_i32, %c0_i32_0 : i32, i32
  }
  func.func @transform_2(%arg0: i32) -> (i32, i32) {
    %c0_i32 = arith.constant 0 : i32
    %c0_i32_0 = arith.constant 0 : i32
    %c0_i32_1 = arith.constant 0 : i32
    return %c0_i32, %c0_i32_0 : i32, i32
  }
  func.func @transform_3(%arg0: i32) -> (i32, i32) {
    %c0_i32 = arith.constant 0 : i32
    %c0_i32_0 = arith.constant 0 : i32
    %c0_i32_1 = arith.constant 0 : i32
    return %c0_i32, %c0_i32_0 : i32, i32
  }
  func.func @transform_4(%arg0: i32) -> (i32, i32) {
    %c0_i32 = arith.constant 0 : i32
    %c0_i32_0 = arith.constant 0 : i32
    %c0_i32_1 = arith.constant 0 : i32
    return %c0_i32, %c0_i32_0 : i32, i32
  }
  func.func @transform_5(%arg0: i32) -> (i32, i32) {
    %c0_i32 = arith.constant 0 : i32
    %c0_i32_0 = arith.constant 0 : i32
    %c0_i32_1 = arith.constant 0 : i32
    return %c0_i32, %c0_i32_0 : i32, i32
  }
  func.func @transform_6(%arg0: i32) -> (i32, i32) {
    %c0_i32 = arith.constant 0 : i32
    %c0_i32_0 = arith.constant 0 : i32
    %c0_i32_1 = arith.constant 0 : i32
    return %c0_i32, %c0_i32_0 : i32, i32
  }
  func.func @transform_7(%arg0: i32) -> (i32, i32) {
    %c0_i32 = arith.constant 0 : i32
    %c0_i32_0 = arith.constant 0 : i32
    return %arg0, %c0_i32 : i32, i32
  }
}

</mosaic_0001>

<bundles_post_ra>
// kernel: mlp_forward.1
= control target key start
LH: loop header
LB: loop body
LE: loop exit
PB: predicated region body
PF: predicated region fallthrough
CT: control target
= control target key end

     0   :  { %vm67_vm0 = vcmask 130048   ;;  %vm949_vm1 = vcmask 64512   ;;  %s1885_s1 = inlined_call_operand.vmem [shape: f32[16,128], index: 1, kind: input, shape index: {}]   ;;  %s1886_s0 = inlined_call_operand.vmem [shape: f32[256,16], index: 0, kind: input, shape index: {}]   ;;  %s1887_s3 = inlined_call_operand.vmem [shape: f32[128,128], index: 3, kind: input, shape index: {}]   ;;  %s1888_s5 = inlined_call_operand.vmem [shape: f32[128,8], index: 5, kind: input, shape index: {}]   ;;  %s1889_s2 = inlined_call_operand.vmem [shape: f32[1,128], index: 2, kind: input, shape index: {}]   ;;  %s1890_s4 = inlined_call_operand.vmem [shape: f32[1,128], index: 4, kind: input, shape index: {}]   ;;  %s1891_s6 = inlined_call_operand.vmem [shape: f32[1,8], index: 6, kind: input, shape index: {}]   ;;  %s1892_s7 = inlined_call_operand.vmem [shape: f32[256,8], index: 7, kind: output, shape index: {}]  }
   0x1   :  { %v59_v0 = vld [vmem:[%s1885_s1 + $0x8] sm:$0xff]  ;;  %v58_v1 = vld [vmem:[%s1885_s1] sm:$0xff]  ;;  %v28_v4 = vld [vmem:[%s1886_s0 + $0x10] sm:$0xff] }
   0x2   :  { %v26_v2 = vld [vmem:[%s1886_s0] sm:$0xff]  ;;  %1151 = vmatprep.subr.mxu0 %v59_v0  ;;  %v27_v3 = vld [vmem:[%s1886_s0 + $0x8] sm:$0xff]  ;;  %1363 = vmatprep.subr.mxu1 %v59_v0  ;;  %v29_v5 = vld [vmem:[%s1886_s0 + $0x18] sm:$0xff] }
   0x3   :  { %1155 = vmatprep.mubr.msk.f32.mxu0 %vm67_vm0, %v26_v2  ;;  %1152 = vmatpush3.msra.mxu0 %v59_v0  ;;  %v42_v6 = vld [vmem:[%s1886_s0 + $0x80] sm:$0xff]  ;;  %v43_v7 = vld [vmem:[%s1886_s0 + $0x88] sm:$0xff]  ;;  %v44_v8 = vld [vmem:[%s1886_s0 + $0x90] sm:$0xff] }
   0x4   :  { %1153 = vmatprep.subr.mxu0 %v58_v1  ;;  %1365 = vmatpush3.msra.mxu1 %v59_v0  ;;  %v30_v9 = vld [vmem:[%s1886_s0 + $0x20] sm:$0xff]  ;;  %v45_v10 = vld [vmem:[%s1886_s0 + $0x98] sm:$0xff]  ;;  %v31_v11 = vld [vmem:[%s1886_s0 + $0x28] sm:$0xff] }
   0x5   :  { %1154 = vmatpush3.msra.mxu0 %v58_v1  ;;  %1364 = vmatprep.subr.mxu1 %v58_v1  ;;  %v46_v12 = vld [vmem:[%s1886_s0 + $0xa0] sm:$0xff]  ;;  %v32_v13 = vld [vmem:[%s1886_s0 + $0x30] sm:$0xff]  ;;  %v436_v14 = vld [vmem:[%s1887_s3 + $0x78] sm:$0xff] }
   0x6   :  { %1156 = vmatmul.mubr.msk.f32.vlgmr.msra.gmra.mxu0 %vm67_vm0, %v27_v3  ;;  %1366 = vmatpush3.msra.mxu1 %v58_v1  ;;  %v435_v15 = vld [vmem:[%s1887_s3 + $0x70] sm:$0xff]  ;;  %v47_v16 = vld [vmem:[%s1886_s0 + $0xa8] sm:$0xff]  ;;  %v33_v17 = vld [vmem:[%s1886_s0 + $0x38] sm:$0xff] }
   0x7   :  { %1158 = vmatprep.mubr.msk.f32.mxu0 %vm67_vm0, %v28_v4  ;;  %1179 = vmatprep.mubr.msk.f32.mxu1 %vm67_vm0, %v42_v6  ;;  %v48_v18 = vld [vmem:[%s1886_s0 + $0xb0] sm:$0xff]  ;;  %v34_v19 = vld [vmem:[%s1886_s0 + $0x40] sm:$0xff]  ;;  %v434_v20 = vld [vmem:[%s1887_s3 + $0x68] sm:$0xff] }
   0x8   :  { %1180 = vmatmul.mubr.msk.f32.vlgmr.msra.gmra.mxu1 %vm67_vm0, %v43_v7  ;;  %1203 = vmatprep.subr.mxu1 %v436_v14  ;;  %v49_v21 = vld [vmem:[%s1886_s0 + $0xb8] sm:$0xff]  ;;  %v35_v22 = vld [vmem:[%s1886_s0 + $0x48] sm:$0xff]  ;;  %v50_v23 = vld [vmem:[%s1886_s0 + $0xc0] sm:$0xff] }
   0x9   :  { %1182 = vmatprep.mubr.msk.f32.mxu1 %vm67_vm0, %v44_v8  ;;  %1204 = vmatpush3.msra.mxu1 %v436_v14  ;;  %v36_v24 = vld [vmem:[%s1886_s0 + $0x50] sm:$0xff]  ;;  %v433_v25 = vld [vmem:[%s1887_s3 + $0x60] sm:$0xff]  ;;  %v51_v26 = vld [vmem:[%s1886_s0 + $0xc8] sm:$0xff] }
   0xa   :  { %1159 = vmatmul.mubr.msk.f32.gmra.mxu0 %vm67_vm0, %v29_v5  ;;  %1205 = vmatprep.subr.mxu1 %v435_v15  ;;  %v37_v27 = vld [vmem:[%s1886_s0 + $0x58] sm:$0xff]  ;;  %v52_v28 = vld [vmem:[%s1886_s0 + $0xd0] sm:$0xff]  ;;  %v38_v29 = vld [vmem:[%s1886_s0 + $0x60] sm:$0xff] }
   0xb   :  { %1161 = vmatprep.mubr.msk.f32.mxu0 %vm67_vm0, %v30_v9  ;;  %1206 = vmatpush3.msra.mxu1 %v435_v15  ;;  %v432_v30 = vld [vmem:[%s1887_s3 + $0x58] sm:$0xff]  ;;  %v39_v32 = vld [vmem:[%s1886_s0 + $0x68] sm:$0xff]  ;;  %v54_v33 = vld [vmem:[%s1886_s0 + $0xe0] sm:$0xff] }
   0xc   :  { %1183 = vmatmul.mubr.msk.f32.gmra.mxu1 %vm67_vm0, %v45_v10  ;;  %1207 = vmatprep.subr.mxu1 %v434_v20  ;;  %v53_v31 = vld [vmem:[%s1886_s0 + $0xd8] sm:$0xff]  ;;  %v40_v34 = vld [vmem:[%s1886_s0 + $0x70] sm:$0xff]  ;;  %v55_v36 = vld [vmem:[%s1886_s0 + $0xe8] sm:$0xff] }
   0xd   :  { %1185 = vmatprep.mubr.msk.f32.mxu1 %vm67_vm0, %v46_v12  ;;  %1208 = vmatpush3.msra.mxu1 %v434_v20  ;;  %v431_v35 = vld [vmem:[%s1887_s3 + $0x50] sm:$0xff]  ;;  %v41_v37 = vld [vmem:[%s1886_s0 + $0x78] sm:$0xff]  ;;  %v430_v39 = vld [vmem:[%s1887_s3 + $0x48] sm:$0xff] }
   0xe   :  { %1162 = vmatmul.mubr.msk.f32.gmra.mxu0 %vm67_vm0, %v31_v11  ;;  %1209 = vmatprep.subr.mxu1 %v433_v25  ;;  %v56_v38 = vld [vmem:[%s1886_s0 + $0xf0] sm:$0xff]  ;;  %v57_v40 = vld [vmem:[%s1886_s0 + $0xf8] sm:$0xff]  ;;  %v429_v41 = vld [vmem:[%s1887_s3 + $0x40] sm:$0xff] }
   0xf   :  { %1164 = vmatprep.mubr.msk.f32.mxu0 %vm67_vm0, %v32_v13  ;;  %1210 = vmatpush3.msra.mxu1 %v433_v25  ;;  %v428_v42 = vld [vmem:[%s1887_s3 + $0x38] sm:$0xff]  ;;  %v427_v43 = vld [vmem:[%s1887_s3 + $0x30] sm:$0xff]  ;;  %v426_v44 = vld [vmem:[%s1887_s3 + $0x28] sm:$0xff] }
  0x10   :  { %1186 = vmatmul.mubr.msk.f32.gmra.mxu1 %vm67_vm0, %v47_v16  ;;  %1211 = vmatprep.subr.mxu1 %v432_v30  ;;  %v425_v45 = vld [vmem:[%s1887_s3 + $0x20] sm:$0xff]  ;;  %v424_v46 = vld [vmem:[%s1887_s3 + $0x18] sm:$0xff]  ;;  %v423_v47 = vld [vmem:[%s1887_s3 + $0x10] sm:$0xff] }
  0x11   :  { %1188 = vmatprep.mubr.msk.f32.mxu1 %vm67_vm0, %v48_v18  ;;  %1212 = vmatpush3.msra.mxu1 %v432_v30  ;;  %v422_v48 = vld [vmem:[%s1887_s3 + $0x8] sm:$0xff]  ;;  %v421_v49 = vld [vmem:[%s1887_s3] sm:$0xff]  ;;  %v716_v50 = vld [vmem:[%s1888_s5 + $0x78] sm:$0xff] }
  0x12   :  { %1165 = vmatmul.mubr.msk.f32.gmra.mxu0 %vm67_vm0, %v33_v17  ;;  %1213 = vmatprep.subr.mxu1 %v431_v35  ;;  %v715_v51 = vld [vmem:[%s1888_s5 + $0x70] sm:$0xff]  ;;  %v714_v52 = vld [vmem:[%s1888_s5 + $0x68] sm:$0xff]  ;;  %v713_v53 = vld [vmem:[%s1888_s5 + $0x60] sm:$0xff] }
  0x13   :  { %1167 = vmatprep.mubr.msk.f32.mxu0 %vm67_vm0, %v34_v19  ;;  %1214 = vmatpush3.msra.mxu1 %v431_v35  ;;  %v712_v54 = vld [vmem:[%s1888_s5 + $0x58] sm:$0xff]  ;;  %v711_v55 = vld [vmem:[%s1888_s5 + $0x50] sm:$0xff]  ;;  %v710_v56 = vld [vmem:[%s1888_s5 + $0x48] sm:$0xff] }
  0x14   :  { %1189 = vmatmul.mubr.msk.f32.gmra.mxu1 %vm67_vm0, %v49_v21  ;;  %1215 = vmatprep.subr.mxu1 %v430_v39  ;;  %v709_v57 = vld [vmem:[%s1888_s5 + $0x40] sm:$0xff]  ;;  %v708_v58 = vld [vmem:[%s1888_s5 + $0x38] sm:$0xff]  ;;  %v707_v59 = vld [vmem:[%s1888_s5 + $0x30] sm:$0xff] }
  0x15   :  { %1191 = vmatprep.mubr.msk.f32.mxu1 %vm67_vm0, %v50_v23  ;;  %1216 = vmatpush3.msra.mxu1 %v430_v39  ;;  %v706_v60 = vld [vmem:[%s1888_s5 + $0x28] sm:$0xff]  ;;  %v705_v61 = vld [vmem:[%s1888_s5 + $0x20] sm:$0xff]  ;;  %v704_v62 = vld [vmem:[%s1888_s5 + $0x18] sm:$0xff] }
  0x16   :  { %1168 = vmatmul.mubr.msk.f32.gmra.mxu0 %vm67_vm0, %v35_v22  ;;  %1217 = vmatprep.subr.mxu1 %v429_v41  ;;  %v1631_v63 = vld [vmem:[%s1889_s2] ss:$0 sm:$0xff] }
  0x17   :  { %1170 = vmatprep.mubr.msk.f32.mxu0 %vm67_vm0, %v36_v24  ;;  %1218 = vmatpush3.msra.mxu1 %v429_v41 }
  0x18   :  { %1192 = vmatmul.mubr.msk.f32.gmra.mxu1 %vm67_vm0, %v51_v26  ;;  %1219 = vmatprep.subr.mxu1 %v428_v42 }
  0x19   :  { %1194 = vmatprep.mubr.msk.f32.mxu1 %vm67_vm0, %v52_v28  ;;  %1220 = vmatpush3.msra.mxu1 %v428_v42 }
  0x1a   :  { %1171 = vmatmul.mubr.msk.f32.gmra.mxu0 %vm67_vm0, %v37_v27  ;;  %1221 = vmatprep.subr.mxu1 %v427_v43 }
  0x1b   :  { %1173 = vmatprep.mubr.msk.f32.mxu0 %vm67_vm0, %v38_v29  ;;  %1222 = vmatpush3.msra.mxu1 %v427_v43 }
  0x1c   :  { %1195 = vmatmul.mubr.msk.f32.gmra.mxu1 %vm67_vm0, %v53_v31  ;;  %1223 = vmatprep.subr.mxu1 %v426_v44 }
  0x1d   :  { %1197 = vmatprep.mubr.msk.f32.mxu1 %vm67_vm0, %v54_v33  ;;  %1224 = vmatpush3.msra.mxu1 %v426_v44 }
  0x1e   :  { %1174 = vmatmul.mubr.msk.f32.gmra.mxu0 %vm67_vm0, %v39_v32  ;;  %1225 = vmatprep.subr.mxu1 %v425_v45 }
  0x1f   :  { %1176 = vmatprep.mubr.msk.f32.mxu0 %vm67_vm0, %v40_v34  ;;  %1226 = vmatpush3.msra.mxu1 %v425_v45 }
  0x20   :  { %1198 = vmatmul.mubr.msk.f32.gmra.mxu1 %vm67_vm0, %v55_v36  ;;  %1227 = vmatprep.subr.mxu1 %v424_v46 }
  0x21   :  { %1200 = vmatprep.mubr.msk.f32.mxu1 %vm67_vm0, %v56_v38  ;;  %1228 = vmatpush3.msra.mxu1 %v424_v46 }
  0x22   :  { %1177 = vmatmul.mubr.msk.f32.gmra.mxu0 %vm67_vm0, %v41_v37  ;;  %1229 = vmatprep.subr.mxu1 %v423_v47 }
  0x23   :  { %1230 = vmatpush3.msra.mxu1 %v423_v47  ;;  %1283 = vmatprep.subr.mxu0 %v716_v50 }
  0x24   :  { %1201 = vmatmul.mubr.msk.f32.gmra.mxu1 %vm67_vm0, %v57_v40  ;;  %1231 = vmatprep.subr.mxu1 %v422_v48 }
  0x25   :  { %1232 = vmatpush3.msra.mxu1 %v422_v48  ;;  %1284 = vmatpush3.msra.mxu0 %v716_v50 }
  0x26   :  { %1233 = vmatprep.subr.mxu1 %v421_v49  ;;  %1285 = vmatprep.subr.mxu0 %v715_v51 }
  0x27   :  { %1234 = vmatpush3.msra.mxu1 %v421_v49  ;;  %1286 = vmatpush3.msra.mxu0 %v715_v51 }
  0x28   :  { %1287 = vmatprep.subr.mxu0 %v714_v52 }
  0x29   :  { %1288 = vmatpush3.msra.mxu0 %v714_v52 }
  0x2a   :  { %1289 = vmatprep.subr.mxu0 %v713_v53 }
  0x2b   :  { %1290 = vmatpush3.msra.mxu0 %v713_v53 }
  0x2c   :  { %1291 = vmatprep.subr.mxu0 %v712_v54 }
  0x2d   :  { %1292 = vmatpush3.msra.mxu0 %v712_v54 }
  0x2e   :  { %1293 = vmatprep.subr.mxu0 %v711_v55 }
  0x2f   :  { %1294 = vmatpush3.msra.mxu0 %v711_v55 }
  0x30   :  { %1295 = vmatprep.subr.mxu0 %v710_v56 }
  0x31   :  { %1296 = vmatpush3.msra.mxu0 %v710_v56 }
  0x32   :  { %1297 = vmatprep.subr.mxu0 %v709_v57 }
  0x33   :  { %1298 = vmatpush3.msra.mxu0 %v709_v57 }
  0x34   :  { %1299 = vmatprep.subr.mxu0 %v708_v58 }
  0x35   :  { %1300 = vmatpush3.msra.mxu0 %v708_v58 }
  0x36   :  { %1301 = vmatprep.subr.mxu0 %v707_v59 }
  0x37   :  { %1302 = vmatpush3.msra.mxu0 %v707_v59 }
  0x38   :  { %1303 = vmatprep.subr.mxu0 %v706_v60 }
  0x39   :  { %1304 = vmatpush3.msra.mxu0 %v706_v60 }
  0x3a   :  { %1305 = vmatprep.subr.mxu0 %v705_v61 }
  0x3b   :  { %1306 = vmatpush3.msra.mxu0 %v705_v61 }
  0x3c   :  { %1307 = vmatprep.subr.mxu0 %v704_v62 }
  0x3d   :  { %1308 = vmatpush3.msra.mxu0 %v704_v62 }
  0xc6   :  { %v1157_v0 = vpop.f32.mrf.mxu0 }
  0xc7   :  { %v236_v1 = vadd.f32 %v1157_v0, %v1631_v63 }
  0xc8   :  { %v230_v2 = vpop.f32.mrf.mxu0  ;;  %v1635_v4 = vpop.f32.mrf.mxu1 }
  0xc9   :  { %v231_v3 = vadd.f32 %v1631_v63, %v230_v2  ;;  %v390_v8 = vmax.f32 %v236_v1, 0.0  ;;  %v316_v61 = vadd.f32 %v1635_v4, %v1631_v63 }
  0xca   :  { %v1160_v5 = vpop.f32.mrf.mxu0  ;;  %v310_v7 = vpop.f32.mrf.mxu1 }
  0xcb   :  { %v389_v6 = vmax.f32 %v231_v3, 0.0  ;;  %v246_v9 = vadd.f32 %v1160_v5, %v1631_v63  ;;  %v311_v51 = vadd.f32 %v1631_v63, %v310_v7  ;;  %v406_v2 = vmax.f32 %v316_v61, 0.0 }
  0xcc   :  { %v240_v10 = vpop.f32.mrf.mxu0  ;;  %v1639_v12 = vpop.f32.mrf.mxu1 }
  0xcd   :  { %v241_v11 = vadd.f32 %v1631_v63, %v240_v10  ;;  %1235 = vmatprep.mubr.f32.mxu1 %v389_v6  ;;  %v392_v16 = vmax.f32 %v246_v9, 0.0  ;;  %v405_v58 = vmax.f32 %v311_v51, 0.0  ;;  %v326_v3 = vadd.f32 %v1639_v12, %v1631_v63 }
  0xce   :  { %v1163_v13 = vpop.f32.mrf.mxu0  ;;  %1236 = vmatmul.mubr.f32.vlgmr.msra.gmra.mxu1 %v390_v8  ;;  %v320_v15 = vpop.f32.mrf.mxu1 }
  0xcf   :  { %v391_v14 = vmax.f32 %v241_v11, 0.0  ;;  %v256_v17 = vadd.f32 %v1163_v13, %v1631_v63  ;;  %v321_v59 = vadd.f32 %v1631_v63, %v320_v15  ;;  %v408_v8 = vmax.f32 %v326_v3, 0.0 }
  0xd0   :  { %v250_v18 = vpop.f32.mrf.mxu0  ;;  %v1643_v20 = vpop.f32.mrf.mxu1 }
  0xd1   :  { %v251_v19 = vadd.f32 %v1631_v63, %v250_v18  ;;  %1238 = vmatprep.mubr.f32.mxu1 %v391_v14  ;;  %v394_v23 = vmax.f32 %v256_v17, 0.0  ;;  %v407_v0 = vmax.f32 %v321_v59, 0.0  ;;  %v336_v4 = vadd.f32 %v1643_v20, %v1631_v63 }
  0xd2   :  { %v1166_v21 = vpop.f32.mrf.mxu0  ;;  %1239 = vmatmul.mubr.f32.gmra.mxu1 %v392_v16  ;;  %v330_v26 = vpop.f32.mrf.mxu1 }
  0xd3   :  { %v393_v22 = vmax.f32 %v251_v19, 0.0  ;;  %v266_v24 = vadd.f32 %v1166_v21, %v1631_v63  ;;  %v331_v1 = vadd.f32 %v1631_v63, %v330_v26  ;;  %v410_v13 = vmax.f32 %v336_v4, 0.0 }
  0xd4   :  { %v260_v25 = vpop.f32.mrf.mxu0  ;;  %v1190_v33 = vpop.f32.mrf.mxu1 }
  0xd5   :  { %v261_v27 = vadd.f32 %v1631_v63, %v260_v25  ;;  %1241 = vmatprep.mubr.f32.mxu1 %v393_v22  ;;  %v396_v30 = vmax.f32 %v266_v24, 0.0  ;;  %v409_v6 = vmax.f32 %v331_v1, 0.0  ;;  %v346_v14 = vadd.f32 %v1190_v33, %v1631_v63  ;;  %v703_v33 = vld [vmem:[%s1888_s5 + $0x10] sm:$0xff] }
  0xd6   :  { %v1169_v28 = vpop.f32.mrf.mxu0  ;;  %1242 = vmatmul.mubr.f32.gmra.mxu1 %v394_v23  ;;  %v340_v40 = vpop.f32.mrf.mxu1  ;;  %1309 = vmatprep.subr.mxu0 %v703_v33 }
  0xd7   :  { %v395_v29 = vmax.f32 %v261_v27, 0.0  ;;  %v276_v31 = vadd.f32 %v1169_v28, %v1631_v63  ;;  %v341_v7 = vadd.f32 %v1631_v63, %v340_v40  ;;  %v412_v17 = vmax.f32 %v346_v14, 0.0  ;;  %1310 = vmatpush3.msra.mxu0 %v703_v33 }
  0xd8   :  { %v270_v32 = vpop.f32.mrf.mxu0  ;;  %v1193_v47 = vpop.f32.mrf.mxu1 }
  0xd9   :  { %v271_v34 = vadd.f32 %v1631_v63, %v270_v32  ;;  %1244 = vmatprep.mubr.f32.mxu1 %v395_v29  ;;  %v398_v37 = vmax.f32 %v276_v31, 0.0  ;;  %v411_v10 = vmax.f32 %v341_v7, 0.0  ;;  %v356_v18 = vadd.f32 %v1193_v47, %v1631_v63 }
  0xda   :  { %v1172_v35 = vpop.f32.mrf.mxu0  ;;  %1245 = vmatmul.mubr.f32.gmra.mxu1 %v396_v30  ;;  %v350_v55 = vpop.f32.mrf.mxu1 }
  0xdb   :  { %v397_v36 = vmax.f32 %v271_v34, 0.0  ;;  %v286_v38 = vadd.f32 %v1172_v35, %v1631_v63  ;;  %v351_v11 = vadd.f32 %v1631_v63, %v350_v55  ;;  %v414_v22 = vmax.f32 %v356_v18, 0.0  ;;  %v702_v34 = vld [vmem:[%s1888_s5 + $0x8] sm:$0xff]  ;;  %v1686_v35 = vld [vmem:[%s1890_s4] ss:$0 sm:$0xff] }
  0xdc   :  { %v280_v39 = vpop.f32.mrf.mxu0  ;;  %v1196_v62 = vpop.f32.mrf.mxu1  ;;  %1311 = vmatprep.subr.mxu0 %v702_v34 }
  0xdd   :  { %v281_v41 = vadd.f32 %v1631_v63, %v280_v39  ;;  %1247 = vmatprep.mubr.f32.mxu1 %v397_v36  ;;  %v400_v44 = vmax.f32 %v286_v38, 0.0  ;;  %v413_v15 = vmax.f32 %v351_v11, 0.0  ;;  %v366_v23 = vadd.f32 %v1196_v62, %v1631_v63  ;;  %1312 = vmatpush3.msra.mxu0 %v702_v34 }
  0xde   :  { %v1175_v42 = vpop.f32.mrf.mxu0  ;;  %1248 = vmatmul.mubr.f32.gmra.mxu1 %v398_v37  ;;  %v360_v5 = vpop.f32.mrf.mxu1 }
  0xdf   :  { %v399_v43 = vmax.f32 %v281_v41, 0.0  ;;  %v296_v45 = vadd.f32 %v1175_v42, %v1631_v63  ;;  %v361_v16 = vadd.f32 %v1631_v63, %v360_v5  ;;  %v416_v27 = vmax.f32 %v366_v23, 0.0 }
  0xe0   :  { %v290_v46 = vpop.f32.mrf.mxu0  ;;  %v1199_v9 = vpop.f32.mrf.mxu1 }
  0xe1   :  { %v291_v48 = vadd.f32 %v1631_v63, %v290_v46  ;;  %1250 = vmatprep.mubr.f32.mxu1 %v399_v43  ;;  %v402_v52 = vmax.f32 %v296_v45, 0.0  ;;  %v415_v20 = vmax.f32 %v361_v16, 0.0  ;;  %v376_v28 = vadd.f32 %v1199_v9, %v1631_v63 }
  0xe2   :  { %v1178_v49 = vpop.f32.mrf.mxu0  ;;  %1251 = vmatmul.mubr.f32.gmra.mxu1 %v400_v44  ;;  %v370_v12 = vpop.f32.mrf.mxu1 }
  0xe3   :  { %v401_v50 = vmax.f32 %v291_v48, 0.0  ;;  %v306_v53 = vadd.f32 %v1178_v49, %v1631_v63  ;;  %v371_v21 = vadd.f32 %v1631_v63, %v370_v12  ;;  %v418_v30 = vmax.f32 %v376_v28, 0.0 }
  0xe4   :  { %v300_v54 = vpop.f32.mrf.mxu0  ;;  %v1202_v19 = vpop.f32.mrf.mxu1 }
  0xe5   :  { %v301_v56 = vadd.f32 %v1631_v63, %v300_v54  ;;  %1253 = vmatprep.mubr.f32.mxu1 %v401_v50  ;;  %v404_v60 = vmax.f32 %v306_v53, 0.0  ;;  %v417_v25 = vmax.f32 %v371_v21, 0.0  ;;  %v386_v31 = vadd.f32 %v1202_v19, %v1631_v63 }
  0xe6   :  { %1254 = vmatmul.mubr.f32.gmra.mxu1 %v402_v52  ;;  %v380_v24 = vpop.f32.mrf.mxu1 }
  0xe7   :  { %v403_v57 = vmax.f32 %v301_v56, 0.0  ;;  %v381_v26 = vadd.f32 %v1631_v63, %v380_v24  ;;  %v420_v32 = vmax.f32 %v386_v31, 0.0  ;;  %v701_v63 = vld [vmem:[%s1888_s5] sm:$0xff] }
  0xe8   :  { %1313 = vmatprep.subr.mxu0 %v701_v63 }
  0xe9   :  { %1256 = vmatprep.mubr.f32.mxu1 %v403_v57  ;;  %v419_v29 = vmax.f32 %v381_v26, 0.0  ;;  %1314 = vmatpush3.msra.mxu0 %v701_v63 }
  0xea   :  { %1257 = vmatmul.mubr.f32.gmra.mxu1 %v404_v60 }
  0xeb   :  { %1259 = vmatprep.mubr.f32.mxu1 %v405_v58 }
  0xee   :  { %1260 = vmatmul.mubr.f32.gmra.mxu1 %v406_v2 }
  0xef   :  { %1262 = vmatprep.mubr.f32.mxu1 %v407_v0 }
  0xf2   :  { %1263 = vmatmul.mubr.f32.gmra.mxu1 %v408_v8 }
  0xf3   :  { %1265 = vmatprep.mubr.f32.mxu1 %v409_v6 }
  0xf6   :  { %1266 = vmatmul.mubr.f32.gmra.mxu1 %v410_v13 }
  0xf7   :  { %1268 = vmatprep.mubr.f32.mxu1 %v411_v10 }
  0xfa   :  { %1269 = vmatmul.mubr.f32.gmra.mxu1 %v412_v17 }
  0xfb   :  { %1271 = vmatprep.mubr.f32.mxu1 %v413_v15 }
  0xfe   :  { %1272 = vmatmul.mubr.f32.gmra.mxu1 %v414_v22 }
  0xff   :  { %1274 = vmatprep.mubr.f32.mxu1 %v415_v20 }
 0x102   :  { %1275 = vmatmul.mubr.f32.gmra.mxu1 %v416_v27 }
 0x103   :  { %1277 = vmatprep.mubr.f32.mxu1 %v417_v25 }
 0x106   :  { %1278 = vmatmul.mubr.f32.gmra.mxu1 %v418_v30 }
 0x107   :  { %1280 = vmatprep.mubr.f32.mxu1 %v419_v29 }
 0x10a   :  { %1281 = vmatmul.mubr.f32.gmra.mxu1 %v420_v32 }
 0x18e   :  { %v1237_v36 = vpop.f32.mrf.mxu1 }
 0x18f   :  { %v516_v37 = vadd.f32 %v1237_v36, %v1686_v35 }
 0x190   :  { %v510_v38 = vpop.f32.mrf.mxu1 }
 0x191   :  { %v511_v39 = vadd.f32 %v1686_v35, %v510_v38  ;;  %v670_v42 = vmax.f32 %v516_v37, 0.0 }
 0x192   :  { %v1240_v40 = vpop.f32.mrf.mxu1 }
 0x193   :  { %v669_v41 = vmax.f32 %v511_v39, 0.0  ;;  %v526_v43 = vadd.f32 %v1240_v40, %v1686_v35 }
 0x194   :  { %v520_v44 = vpop.f32.mrf.mxu1 }
 0x195   :  { %v521_v45 = vadd.f32 %v1686_v35, %v520_v44  ;;  %1315 = vmatprep.mubr.f32.mxu0 %v669_v41  ;;  %v672_v48 = vmax.f32 %v526_v43, 0.0 }
 0x196   :  { %v1243_v46 = vpop.f32.mrf.mxu1  ;;  %1316 = vmatmul.mubr.f32.vlgmr.msra.gmra.mxu0 %v670_v42 }
 0x197   :  { %v671_v47 = vmax.f32 %v521_v45, 0.0  ;;  %v536_v49 = vadd.f32 %v1243_v46, %v1686_v35 }
 0x198   :  { %v530_v50 = vpop.f32.mrf.mxu1 }
 0x199   :  { %v531_v51 = vadd.f32 %v1686_v35, %v530_v50  ;;  %1318 = vmatprep.mubr.f32.mxu0 %v671_v47  ;;  %v674_v54 = vmax.f32 %v536_v49, 0.0 }
 0x19a   :  { %v1246_v52 = vpop.f32.mrf.mxu1  ;;  %1319 = vmatmul.mubr.f32.gmra.mxu0 %v672_v48 }
 0x19b   :  { %v673_v53 = vmax.f32 %v531_v51, 0.0  ;;  %v546_v55 = vadd.f32 %v1246_v52, %v1686_v35 }
 0x19c   :  { %v540_v56 = vpop.f32.mrf.mxu1 }
 0x19d   :  { %v541_v57 = vadd.f32 %v1686_v35, %v540_v56  ;;  %1321 = vmatprep.mubr.f32.mxu0 %v673_v53  ;;  %v676_v60 = vmax.f32 %v546_v55, 0.0 }
 0x19e   :  { %v1249_v58 = vpop.f32.mrf.mxu1  ;;  %1322 = vmatmul.mubr.f32.gmra.mxu0 %v674_v54 }
 0x19f   :  { %v675_v59 = vmax.f32 %v541_v57, 0.0  ;;  %v556_v61 = vadd.f32 %v1249_v58, %v1686_v35 }
 0x1a0   :  { %v550_v62 = vpop.f32.mrf.mxu1 }
 0x1a1   :  { %v551_v0 = vadd.f32 %v1686_v35, %v550_v62  ;;  %1324 = vmatprep.mubr.f32.mxu0 %v675_v59  ;;  %v678_v3 = vmax.f32 %v556_v61, 0.0 }
 0x1a2   :  { %v1252_v1 = vpop.f32.mrf.mxu1  ;;  %1325 = vmatmul.mubr.f32.gmra.mxu0 %v676_v60 }
 0x1a3   :  { %v677_v2 = vmax.f32 %v551_v0, 0.0  ;;  %v566_v5 = vadd.f32 %v1252_v1, %v1686_v35 }
 0x1a4   :  { %v560_v6 = vpop.f32.mrf.mxu1 }
 0x1a5   :  { %v561_v7 = vadd.f32 %v1686_v35, %v560_v6  ;;  %1327 = vmatprep.mubr.f32.mxu0 %v677_v2  ;;  %v680_v9 = vmax.f32 %v566_v5, 0.0 }
 0x1a6   :  { %v1255_v8 = vpop.f32.mrf.mxu1  ;;  %1328 = vmatmul.mubr.f32.gmra.mxu0 %v678_v3 }
 0x1a7   :  { %v679_v4 = vmax.f32 %v561_v7, 0.0  ;;  %v576_v10 = vadd.f32 %v1255_v8, %v1686_v35  ;;  %v1723_v7 = vld [vmem:[%s1891_s6] ss:$0 sm:$0xff] }
 0x1a8   :  { %v570_v11 = vpop.f32.mrf.mxu1 }
 0x1a9   :  { %v571_v13 = vadd.f32 %v1686_v35, %v570_v11  ;;  %1330 = vmatprep.mubr.f32.mxu0 %v679_v4  ;;  %v682_v15 = vmax.f32 %v576_v10, 0.0 }
 0x1aa   :  { %v1258_v14 = vpop.f32.mrf.mxu1  ;;  %1331 = vmatmul.mubr.f32.gmra.mxu0 %v680_v9 }
 0x1ab   :  { %v681_v12 = vmax.f32 %v571_v13, 0.0  ;;  %v586_v16 = vadd.f32 %v1258_v14, %v1686_v35 }
 0x1ac   :  { %v580_v17 = vpop.f32.mrf.mxu1 }
 0x1ad   :  { %v581_v18 = vadd.f32 %v1686_v35, %v580_v17  ;;  %1333 = vmatprep.mubr.f32.mxu0 %v681_v12  ;;  %v684_v21 = vmax.f32 %v586_v16, 0.0 }
 0x1ae   :  { %v1261_v19 = vpop.f32.mrf.mxu1  ;;  %1334 = vmatmul.mubr.f32.gmra.mxu0 %v682_v15 }
 0x1af   :  { %v683_v20 = vmax.f32 %v581_v18, 0.0  ;;  %v596_v22 = vadd.f32 %v1261_v19, %v1686_v35 }
 0x1b0   :  { %v590_v23 = vpop.f32.mrf.mxu1 }
 0x1b1   :  { %v591_v24 = vadd.f32 %v1686_v35, %v590_v23  ;;  %1336 = vmatprep.mubr.f32.mxu0 %v683_v20  ;;  %v686_v27 = vmax.f32 %v596_v22, 0.0 }
 0x1b2   :  { %v1264_v25 = vpop.f32.mrf.mxu1  ;;  %1337 = vmatmul.mubr.f32.gmra.mxu0 %v684_v21 }
 0x1b3   :  { %v685_v26 = vmax.f32 %v591_v24, 0.0  ;;  %v606_v28 = vadd.f32 %v1264_v25, %v1686_v35 }
 0x1b4   :  { %v600_v29 = vpop.f32.mrf.mxu1 }
 0x1b5   :  { %v601_v30 = vadd.f32 %v1686_v35, %v600_v29  ;;  %1339 = vmatprep.mubr.f32.mxu0 %v685_v26  ;;  %v688_v33 = vmax.f32 %v606_v28, 0.0 }
 0x1b6   :  { %v1267_v31 = vpop.f32.mrf.mxu1  ;;  %1340 = vmatmul.mubr.f32.gmra.mxu0 %v686_v27 }
 0x1b7   :  { %v687_v32 = vmax.f32 %v601_v30, 0.0  ;;  %v616_v34 = vadd.f32 %v1267_v31, %v1686_v35 }
 0x1b8   :  { %v610_v63 = vpop.f32.mrf.mxu1 }
 0x1b9   :  { %v611_v36 = vadd.f32 %v1686_v35, %v610_v63  ;;  %1342 = vmatprep.mubr.f32.mxu0 %v687_v32  ;;  %v690_v39 = vmax.f32 %v616_v34, 0.0 }
 0x1ba   :  { %v1270_v37 = vpop.f32.mrf.mxu1  ;;  %1343 = vmatmul.mubr.f32.gmra.mxu0 %v688_v33 }
 0x1bb   :  { %v689_v38 = vmax.f32 %v611_v36, 0.0  ;;  %v626_v40 = vadd.f32 %v1270_v37, %v1686_v35 }
 0x1bc   :  { %v620_v41 = vpop.f32.mrf.mxu1 }
 0x1bd   :  { %v621_v42 = vadd.f32 %v1686_v35, %v620_v41  ;;  %1345 = vmatprep.mubr.f32.mxu0 %v689_v38  ;;  %v692_v45 = vmax.f32 %v626_v40, 0.0 }
 0x1be   :  { %v1273_v43 = vpop.f32.mrf.mxu1  ;;  %1346 = vmatmul.mubr.f32.gmra.mxu0 %v690_v39 }
 0x1bf   :  { %v691_v44 = vmax.f32 %v621_v42, 0.0  ;;  %v636_v46 = vadd.f32 %v1273_v43, %v1686_v35 }
 0x1c0   :  { %v630_v47 = vpop.f32.mrf.mxu1 }
 0x1c1   :  { %v631_v48 = vadd.f32 %v1686_v35, %v630_v47  ;;  %1348 = vmatprep.mubr.f32.mxu0 %v691_v44  ;;  %v694_v51 = vmax.f32 %v636_v46, 0.0 }
 0x1c2   :  { %v1276_v49 = vpop.f32.mrf.mxu1  ;;  %1349 = vmatmul.mubr.f32.gmra.mxu0 %v692_v45 }
 0x1c3   :  { %v693_v50 = vmax.f32 %v631_v48, 0.0  ;;  %v646_v52 = vadd.f32 %v1276_v49, %v1686_v35 }
 0x1c4   :  { %v640_v53 = vpop.f32.mrf.mxu1 }
 0x1c5   :  { %v641_v54 = vadd.f32 %v1686_v35, %v640_v53  ;;  %1351 = vmatprep.mubr.f32.mxu0 %v693_v50  ;;  %v696_v57 = vmax.f32 %v646_v52, 0.0 }
 0x1c6   :  { %v1279_v55 = vpop.f32.mrf.mxu1  ;;  %1352 = vmatmul.mubr.f32.gmra.mxu0 %v694_v51 }
 0x1c7   :  { %v695_v56 = vmax.f32 %v641_v54, 0.0  ;;  %v656_v58 = vadd.f32 %v1279_v55, %v1686_v35 }
 0x1c8   :  { %v650_v59 = vpop.f32.mrf.mxu1 }
 0x1c9   :  { %v651_v60 = vadd.f32 %v1686_v35, %v650_v59  ;;  %1354 = vmatprep.mubr.f32.mxu0 %v695_v56  ;;  %v698_v0 = vmax.f32 %v656_v58, 0.0 }
 0x1ca   :  { %v1282_v61 = vpop.f32.mrf.mxu1  ;;  %1355 = vmatmul.mubr.f32.gmra.mxu0 %v696_v57 }
 0x1cb   :  { %v697_v62 = vmax.f32 %v651_v60, 0.0  ;;  %v666_v1 = vadd.f32 %v1282_v61, %v1686_v35 }
 0x1cc   :  { %v660_v2 = vpop.f32.mrf.mxu1 }
 0x1cd   :  { %v661_v3 = vadd.f32 %v1686_v35, %v660_v2  ;;  %1357 = vmatprep.mubr.f32.mxu0 %v697_v62  ;;  %v700_v6 = vmax.f32 %v666_v1, 0.0 }
 0x1ce   :  { %1358 = vmatmul.mubr.f32.gmra.mxu0 %v698_v0 }
 0x1cf   :  { %v699_v5 = vmax.f32 %v661_v3, 0.0 }
 0x1d1   :  { %1360 = vmatprep.mubr.f32.mxu0 %v699_v5 }
 0x1d2   :  { %1361 = vmatmul.mubr.f32.gmra.mxu0 %v700_v6 }
 0x256   :  { %v1317_v8 = vpop.f32.mrf.mxu0 }
 0x257   :  { %v796_v4 = vadd.f32 %v1317_v8, %v1723_v7 }
 0x258   :  { %v790_v9 = vpop.f32.mrf.mxu0 }
 0x259   :  { %951 = vst.msk [vmem:[%s1892_s7 + $0x8] sm:$0xff] %vm949_vm1, %v796_v4  ;;  %v791_v35 = vadd.f32 %v1723_v7, %v790_v9 }
 0x25a   :  { %v1320_v10 = vpop.f32.mrf.mxu0 }
 0x25b   :  { %950 = vst.msk [vmem:[%s1892_s7] sm:$0xff] %vm949_vm1, %v791_v35  ;;  %v806_v11 = vadd.f32 %v1320_v10, %v1723_v7 }
 0x25c   :  { %v800_v13 = vpop.f32.mrf.mxu0 }
 0x25d   :  { %953 = vst.msk [vmem:[%s1892_s7 + $0x18] sm:$0xff] %vm949_vm1, %v806_v11  ;;  %v801_v14 = vadd.f32 %v1723_v7, %v800_v13 }
 0x25e   :  { %v1323_v12 = vpop.f32.mrf.mxu0 }
 0x25f   :  { %952 = vst.msk [vmem:[%s1892_s7 + $0x10] sm:$0xff] %vm949_vm1, %v801_v14  ;;  %v816_v15 = vadd.f32 %v1323_v12, %v1723_v7 }
 0x260   :  { %v810_v16 = vpop.f32.mrf.mxu0 }
 0x261   :  { %955 = vst.msk [vmem:[%s1892_s7 + $0x28] sm:$0xff] %vm949_vm1, %v816_v15  ;;  %v811_v17 = vadd.f32 %v1723_v7, %v810_v16 }
 0x262   :  { %v1326_v18 = vpop.f32.mrf.mxu0 }
 0x263   :  { %954 = vst.msk [vmem:[%s1892_s7 + $0x20] sm:$0xff] %vm949_vm1, %v811_v17  ;;  %v826_v19 = vadd.f32 %v1326_v18, %v1723_v7 }
 0x264   :  { %v820_v20 = vpop.f32.mrf.mxu0 }
 0x265   :  { %957 = vst.msk [vmem:[%s1892_s7 + $0x38] sm:$0xff] %vm949_vm1, %v826_v19  ;;  %v821_v21 = vadd.f32 %v1723_v7, %v820_v20 }
 0x266   :  { %v1329_v22 = vpop.f32.mrf.mxu0 }
 0x267   :  { %956 = vst.msk [vmem:[%s1892_s7 + $0x30] sm:$0xff] %vm949_vm1, %v821_v21  ;;  %v836_v23 = vadd.f32 %v1329_v22, %v1723_v7 }
 0x268   :  { %v830_v24 = vpop.f32.mrf.mxu0 }
 0x269   :  { %959 = vst.msk [vmem:[%s1892_s7 + $0x48] sm:$0xff] %vm949_vm1, %v836_v23  ;;  %v831_v25 = vadd.f32 %v1723_v7, %v830_v24 }
 0x26a   :  { %v1332_v26 = vpop.f32.mrf.mxu0 }
 0x26b   :  { %958 = vst.msk [vmem:[%s1892_s7 + $0x40] sm:$0xff] %vm949_vm1, %v831_v25  ;;  %v846_v27 = vadd.f32 %v1332_v26, %v1723_v7 }
 0x26c   :  { %v840_v28 = vpop.f32.mrf.mxu0 }
 0x26d   :  { %961 = vst.msk [vmem:[%s1892_s7 + $0x58] sm:$0xff] %vm949_vm1, %v846_v27  ;;  %v841_v29 = vadd.f32 %v1723_v7, %v840_v28 }
 0x26e   :  { %v1335_v30 = vpop.f32.mrf.mxu0 }
 0x26f   :  { %960 = vst.msk [vmem:[%s1892_s7 + $0x50] sm:$0xff] %vm949_vm1, %v841_v29  ;;  %v856_v31 = vadd.f32 %v1335_v30, %v1723_v7 }
 0x270   :  { %v850_v32 = vpop.f32.mrf.mxu0 }
 0x271   :  { %963 = vst.msk [vmem:[%s1892_s7 + $0x68] sm:$0xff] %vm949_vm1, %v856_v31  ;;  %v851_v33 = vadd.f32 %v1723_v7, %v850_v32 }
 0x272   :  { %v1338_v34 = vpop.f32.mrf.mxu0 }
 0x273   :  { %962 = vst.msk [vmem:[%s1892_s7 + $0x60] sm:$0xff] %vm949_vm1, %v851_v33  ;;  %v866_v63 = vadd.f32 %v1338_v34, %v1723_v7 }
 0x274   :  { %v860_v36 = vpop.f32.mrf.mxu0 }
 0x275   :  { %965 = vst.msk [vmem:[%s1892_s7 + $0x78] sm:$0xff] %vm949_vm1, %v866_v63  ;;  %v861_v37 = vadd.f32 %v1723_v7, %v860_v36 }
 0x276   :  { %v1341_v38 = vpop.f32.mrf.mxu0 }
 0x277   :  { %964 = vst.msk [vmem:[%s1892_s7 + $0x70] sm:$0xff] %vm949_vm1, %v861_v37  ;;  %v876_v39 = vadd.f32 %v1341_v38, %v1723_v7 }
 0x278   :  { %v870_v40 = vpop.f32.mrf.mxu0 }
 0x279   :  { %967 = vst.msk [vmem:[%s1892_s7 + $0x88] sm:$0xff] %vm949_vm1, %v876_v39  ;;  %v871_v41 = vadd.f32 %v1723_v7, %v870_v40 }
 0x27a   :  { %v1344_v42 = vpop.f32.mrf.mxu0 }
 0x27b   :  { %966 = vst.msk [vmem:[%s1892_s7 + $0x80] sm:$0xff] %vm949_vm1, %v871_v41  ;;  %v886_v43 = vadd.f32 %v1344_v42, %v1723_v7 }
 0x27c   :  { %v880_v44 = vpop.f32.mrf.mxu0 }
 0x27d   :  { %969 = vst.msk [vmem:[%s1892_s7 + $0x98] sm:$0xff] %vm949_vm1, %v886_v43  ;;  %v881_v45 = vadd.f32 %v1723_v7, %v880_v44 }
 0x27e   :  { %v1347_v46 = vpop.f32.mrf.mxu0 }
 0x27f   :  { %968 = vst.msk [vmem:[%s1892_s7 + $0x90] sm:$0xff] %vm949_vm1, %v881_v45  ;;  %v896_v47 = vadd.f32 %v1347_v46, %v1723_v7 }
 0x280   :  { %v890_v48 = vpop.f32.mrf.mxu0 }
 0x281   :  { %971 = vst.msk [vmem:[%s1892_s7 + $0xa8] sm:$0xff] %vm949_vm1, %v896_v47  ;;  %v891_v49 = vadd.f32 %v1723_v7, %v890_v48 }
 0x282   :  { %v1350_v50 = vpop.f32.mrf.mxu0 }
 0x283   :  { %970 = vst.msk [vmem:[%s1892_s7 + $0xa0] sm:$0xff] %vm949_vm1, %v891_v49  ;;  %v906_v51 = vadd.f32 %v1350_v50, %v1723_v7 }
 0x284   :  { %v900_v52 = vpop.f32.mrf.mxu0 }
 0x285   :  { %973 = vst.msk [vmem:[%s1892_s7 + $0xb8] sm:$0xff] %vm949_vm1, %v906_v51  ;;  %v901_v53 = vadd.f32 %v1723_v7, %v900_v52 }
 0x286   :  { %v1353_v54 = vpop.f32.mrf.mxu0 }
 0x287   :  { %972 = vst.msk [vmem:[%s1892_s7 + $0xb0] sm:$0xff] %vm949_vm1, %v901_v53  ;;  %v916_v55 = vadd.f32 %v1353_v54, %v1723_v7 }
 0x288   :  { %v910_v56 = vpop.f32.mrf.mxu0 }
 0x289   :  { %975 = vst.msk [vmem:[%s1892_s7 + $0xc8] sm:$0xff] %vm949_vm1, %v916_v55  ;;  %v911_v57 = vadd.f32 %v1723_v7, %v910_v56 }
 0x28a   :  { %v1356_v58 = vpop.f32.mrf.mxu0 }
 0x28b   :  { %974 = vst.msk [vmem:[%s1892_s7 + $0xc0] sm:$0xff] %vm949_vm1, %v911_v57  ;;  %v926_v59 = vadd.f32 %v1356_v58, %v1723_v7 }
 0x28c   :  { %v920_v60 = vpop.f32.mrf.mxu0 }
 0x28d   :  { %977 = vst.msk [vmem:[%s1892_s7 + $0xd8] sm:$0xff] %vm949_vm1, %v926_v59  ;;  %v921_v61 = vadd.f32 %v1723_v7, %v920_v60 }
 0x28e   :  { %v1359_v62 = vpop.f32.mrf.mxu0 }
 0x28f   :  { %976 = vst.msk [vmem:[%s1892_s7 + $0xd0] sm:$0xff] %vm949_vm1, %v921_v61  ;;  %v936_v0 = vadd.f32 %v1359_v62, %v1723_v7 }
 0x290   :  { %v930_v1 = vpop.f32.mrf.mxu0 }
 0x291   :  { %979 = vst.msk [vmem:[%s1892_s7 + $0xe8] sm:$0xff] %vm949_vm1, %v936_v0  ;;  %v931_v2 = vadd.f32 %v1723_v7, %v930_v1 }
 0x292   :  { %v1362_v3 = vpop.f32.mrf.mxu0 }
 0x293   :  { %978 = vst.msk [vmem:[%s1892_s7 + $0xe0] sm:$0xff] %vm949_vm1, %v931_v2  ;;  %v946_v5 = vadd.f32 %v1362_v3, %v1723_v7 }
 0x294   :  { %v940_v6 = vpop.f32.mrf.mxu0 }
 0x295   :  { %981 = vst.msk [vmem:[%s1892_s7 + $0xf8] sm:$0xff] %vm949_vm1, %v946_v5  ;;  %v941_v8 = vadd.f32 %v1723_v7, %v940_v6 }
 0x297   :  { %980 = vst.msk [vmem:[%s1892_s7 + $0xf0] sm:$0xff] %vm949_vm1, %v941_v8 }

// kernel: mlp_forward.1
= control target key start
LH: loop header
LB: loop body
LE: loop exit
PB: predicated region body
PF: predicated region fallthrough
CT: control target
= control target key end

     0   :  { %vm67_vm0 = vcmask 130048   ;;  %vm949_vm1 = vcmask 64512   ;;  %s1885_s1 = inlined_call_operand.vmem [shape: f32[16,128], index: 1, kind: input, shape index: {}]   ;;  %s1886_s0 = inlined_call_operand.vmem [shape: f32[256,16], index: 0, kind: input, shape index: {}]   ;;  %s1887_s3 = inlined_call_operand.vmem [shape: f32[128,128], index: 3, kind: input, shape index: {}]   ;;  %s1888_s5 = inlined_call_operand.vmem [shape: f32[128,8], index: 5, kind: input, shape index: {}]   ;;  %s1889_s2 = inlined_call_operand.vmem [shape: f32[1,128], index: 2, kind: input, shape index: {}]   ;;  %s1890_s4 = inlined_call_operand.vmem [shape: f32[1,128], index: 4, kind: input, shape index: {}]   ;;  %s1891_s6 = inlined_call_operand.vmem [shape: f32[1,8], index: 6, kind: input, shape index: {}]   ;;  %s1892_s7 = inlined_call_operand.vmem [shape: f32[256,8], index: 7, kind: output, shape index: {}]  }
   0x1   :  { %v59_v0 = vld [vmem:[%s1885_s1 + $0x8] sm:$0xff]  ;;  %v58_v1 = vld [vmem:[%s1885_s1] sm:$0xff]  ;;  %v28_v4 = vld [vmem:[%s1886_s0 + $0x10] sm:$0xff] }
   0x2   :  { %v26_v2 = vld [vmem:[%s1886_s0] sm:$0xff]  ;;  %1151 = vmatprep.subr.mxu0 %v59_v0  ;;  %v27_v3 = vld [vmem:[%s1886_s0 + $0x8] sm:$0xff]  ;;  %1363 = vmatprep.subr.mxu1 %v59_v0  ;;  %v29_v5 = vld [vmem:[%s1886_s0 + $0x18] sm:$0xff] }
   0x3   :  { %1155 = vmatprep.mubr.msk.f32.mxu0 %vm67_vm0, %v26_v2  ;;  %1152 = vmatpush3.msra.mxu0 %v59_v0  ;;  %v42_v6 = vld [vmem:[%s1886_s0 + $0x80] sm:$0xff]  ;;  %v43_v7 = vld [vmem:[%s1886_s0 + $0x88] sm:$0xff]  ;;  %v44_v8 = vld [vmem:[%s1886_s0 + $0x90] sm:$0xff] }
   0x4   :  { %1153 = vmatprep.subr.mxu0 %v58_v1  ;;  %1365 = vmatpush3.msra.mxu1 %v59_v0  ;;  %v30_v9 = vld [vmem:[%s1886_s0 + $0x20] sm:$0xff]  ;;  %v45_v10 = vld [vmem:[%s1886_s0 + $0x98] sm:$0xff]  ;;  %v31_v11 = vld [vmem:[%s1886_s0 + $0x28] sm:$0xff] }
   0x5   :  { %1154 = vmatpush3.msra.mxu0 %v58_v1  ;;  %1364 = vmatprep.subr.mxu1 %v58_v1  ;;  %v46_v12 = vld [vmem:[%s1886_s0 + $0xa0] sm:$0xff]  ;;  %v32_v13 = vld [vmem:[%s1886_s0 + $0x30] sm:$0xff]  ;;  %v436_v14 = vld [vmem:[%s1887_s3 + $0x78] sm:$0xff] }
   0x6   :  { %1156 = vmatmul.mubr.msk.f32.vlgmr.msra.gmra.mxu0 %vm67_vm0, %v27_v3  ;;  %1366 = vmatpush3.msra.mxu1 %v58_v1  ;;  %v435_v15 = vld [vmem:[%s1887_s3 + $0x70] sm:$0xff]  ;;  %v47_v16 = vld [vmem:[%s1886_s0 + $0xa8] sm:$0xff]  ;;  %v33_v17 = vld [vmem:[%s1886_s0 + $0x38] sm:$0xff] }
   0x7   :  { %1158 = vmatprep.mubr.msk.f32.mxu0 %vm67_vm0, %v28_v4  ;;  %1179 = vmatprep.mubr.msk.f32.mxu1 %vm67_vm0, %v42_v6  ;;  %v48_v18 = vld [vmem:[%s1886_s0 + $0xb0] sm:$0xff]  ;;  %v34_v19 = vld [vmem:[%s1886_s0 + $0x40] sm:$0xff]  ;;  %v434_v20 = vld [vmem:[%s1887_s3 + $0x68] sm:$0xff] }
   0x8   :  { %1180 = vmatmul.mubr.msk.f32.vlgmr.msra.gmra.mxu1 %vm67_vm0, %v43_v7  ;;  %1203 = vmatprep.subr.mxu1 %v436_v14  ;;  %v49_v21 = vld [vmem:[%s1886_s0 + $0xb8] sm:$0xff]  ;;  %v35_v22 = vld [vmem:[%s1886_s0 + $0x48] sm:$0xff]  ;;  %v50_v23 = vld [vmem:[%s1886_s0 + $0xc0] sm:$0xff] }
   0x9   :  { %1182 = vmatprep.mubr.msk.f32.mxu1 %vm67_vm0, %v44_v8  ;;  %1204 = vmatpush3.msra.mxu1 %v436_v14  ;;  %v36_v24 = vld [vmem:[%s1886_s0 + $0x50] sm:$0xff]  ;;  %v433_v25 = vld [vmem:[%s1887_s3 + $0x60] sm:$0xff]  ;;  %v51_v26 = vld [vmem:[%s1886_s0 + $0xc8] sm:$0xff] }
   0xa   :  { %1159 = vmatmul.mubr.msk.f32.gmra.mxu0 %vm67_vm0, %v29_v5  ;;  %1205 = vmatprep.subr.mxu1 %v435_v15  ;;  %v37_v27 = vld [vmem:[%s1886_s0 + $0x58] sm:$0xff]  ;;  %v52_v28 = vld [vmem:[%s1886_s0 + $0xd0] sm:$0xff]  ;;  %v38_v29 = vld [vmem:[%s1886_s0 + $0x60] sm:$0xff] }
   0xb   :  { %1161 = vmatprep.mubr.msk.f32.mxu0 %vm67_vm0, %v30_v9  ;;  %1206 = vmatpush3.msra.mxu1 %v435_v15  ;;  %v432_v30 = vld [vmem:[%s1887_s3 + $0x58] sm:$0xff]  ;;  %v39_v32 = vld [vmem:[%s1886_s0 + $0x68] sm:$0xff]  ;;  %v54_v33 = vld [vmem:[%s1886_s0 + $0xe0] sm:$0xff] }
   0xc   :  { %1183 = vmatmul.mubr.msk.f32.gmra.mxu1 %vm67_vm0, %v45_v10  ;;  %1207 = vmatprep.subr.mxu1 %v434_v20  ;;  %v53_v31 = vld [vmem:[%s1886_s0 + $0xd8] sm:$0xff]  ;;  %v40_v34 = vld [vmem:[%s1886_s0 + $0x70] sm:$0xff]  ;;  %v55_v36 = vld [vmem:[%s1886_s0 + $0xe8] sm:$0xff] }
   0xd   :  { %1185 = vmatprep.mubr.msk.f32.mxu1 %vm67_vm0, %v46_v12  ;;  %1208 = vmatpush3.msra.mxu1 %v434_v20  ;;  %v431_v35 = vld [vmem:[%s1887_s3 + $0x50] sm:$0xff]  ;;  %v41_v37 = vld [vmem:[%s1886_s0 + $0x78] sm:$0xff]  ;;  %v430_v39 = vld [vmem:[%s1887_s3 + $0x48] sm:$0xff] }
   0xe   :  { %1162 = vmatmul.mubr.msk.f32.gmra.mxu0 %vm67_vm0, %v31_v11  ;;  %1209 = vmatprep.subr.mxu1 %v433_v25  ;;  %v56_v38 = vld [vmem:[%s1886_s0 + $0xf0] sm:$0xff]  ;;  %v57_v40 = vld [vmem:[%s1886_s0 + $0xf8] sm:$0xff]  ;;  %v429_v41 = vld [vmem:[%s1887_s3 + $0x40] sm:$0xff] }
   0xf   :  { %1164 = vmatprep.mubr.msk.f32.mxu0 %vm67_vm0, %v32_v13  ;;  %1210 = vmatpush3.msra.mxu1 %v433_v25  ;;  %v428_v42 = vld [vmem:[%s1887_s3 + $0x38] sm:$0xff]  ;;  %v427_v43 = vld [vmem:[%s1887_s3 + $0x30] sm:$0xff]  ;;  %v426_v44 = vld [vmem:[%s1887_s3 + $0x28] sm:$0xff] }
  0x10   :  { %1186 = vmatmul.mubr.msk.f32.gmra.mxu1 %vm67_vm0, %v47_v16  ;;  %1211 = vmatprep.subr.mxu1 %v432_v30  ;;  %v425_v45 = vld [vmem:[%s1887_s3 + $0x20] sm:$0xff]  ;;  %v424_v46 = vld [vmem:[%s1887_s3 + $0x18] sm:$0xff]  ;;  %v423_v47 = vld [vmem:[%s1887_s3 + $0x10] sm:$0xff] }
  0x11   :  { %1188 = vmatprep.mubr.msk.f32.mxu1 %vm67_vm0, %v48_v18  ;;  %1212 = vmatpush3.msra.mxu1 %v432_v30  ;;  %v422_v48 = vld [vmem:[%s1887_s3 + $0x8] sm:$0xff]  ;;  %v421_v49 = vld [vmem:[%s1887_s3] sm:$0xff]  ;;  %v716_v50 = vld [vmem:[%s1888_s5 + $0x78] sm:$0xff] }
  0x12   :  { %1165 = vmatmul.mubr.msk.f32.gmra.mxu0 %vm67_vm0, %v33_v17  ;;  %1213 = vmatprep.subr.mxu1 %v431_v35  ;;  %v715_v51 = vld [vmem:[%s1888_s5 + $0x70] sm:$0xff]  ;;  %v714_v52 = vld [vmem:[%s1888_s5 + $0x68] sm:$0xff]  ;;  %v713_v53 = vld [vmem:[%s1888_s5 + $0x60] sm:$0xff] }
  0x13   :  { %1167 = vmatprep.mubr.msk.f32.mxu0 %vm67_vm0, %v34_v19  ;;  %1214 = vmatpush3.msra.mxu1 %v431_v35  ;;  %v712_v54 = vld [vmem:[%s1888_s5 + $0x58] sm:$0xff]  ;;  %v711_v55 = vld [vmem:[%s1888_s5 + $0x50] sm:$0xff]  ;;  %v710_v56 = vld [vmem:[%s1888_s5 + $0x48] sm:$0xff] }
  0x14   :  { %1189 = vmatmul.mubr.msk.f32.gmra.mxu1 %vm67_vm0, %v49_v21  ;;  %1215 = vmatprep.subr.mxu1 %v430_v39  ;;  %v709_v57 = vld [vmem:[%s1888_s5 + $0x40] sm:$0xff]  ;;  %v708_v58 = vld [vmem:[%s1888_s5 + $0x38] sm:$0xff]  ;;  %v707_v59 = vld [vmem:[%s1888_s5 + $0x30] sm:$0xff] }
  0x15   :  { %1191 = vmatprep.mubr.msk.f32.mxu1 %vm67_vm0, %v50_v23  ;;  %1216 = vmatpush3.msra.mxu1 %v430_v39  ;;  %v706_v60 = vld [vmem:[%s1888_s5 + $0x28] sm:$0xff]  ;;  %v705_v61 = vld [vmem:[%s1888_s5 + $0x20] sm:$0xff]  ;;  %v704_v62 = vld [vmem:[%s1888_s5 + $0x18] sm:$0xff] }
  0x16   :  { %1168 = vmatmul.mubr.msk.f32.gmra.mxu0 %vm67_vm0, %v35_v22  ;;  %1217 = vmatprep.subr.mxu1 %v429_v41  ;;  %v1631_v63 = vld [vmem:[%s1889_s2] ss:$0 sm:$0xff] }
  0x17   :  { %1170 = vmatprep.mubr.msk.f32.mxu0 %vm67_vm0, %v36_v24  ;;  %1218 = vmatpush3.msra.mxu1 %v429_v41 }
  0x18   :  { %1192 = vmatmul.mubr.msk.f32.gmra.mxu1 %vm67_vm0, %v51_v26  ;;  %1219 = vmatprep.subr.mxu1 %v428_v42 }
  0x19   :  { %1194 = vmatprep.mubr.msk.f32.mxu1 %vm67_vm0, %v52_v28  ;;  %1220 = vmatpush3.msra.mxu1 %v428_v42 }
  0x1a   :  { %1171 = vmatmul.mubr.msk.f32.gmra.mxu0 %vm67_vm0, %v37_v27  ;;  %1221 = vmatprep.subr.mxu1 %v427_v43 }
  0x1b   :  { %1173 = vmatprep.mubr.msk.f32.mxu0 %vm67_vm0, %v38_v29  ;;  %1222 = vmatpush3.msra.mxu1 %v427_v43 }
  0x1c   :  { %1195 = vmatmul.mubr.msk.f32.gmra.mxu1 %vm67_vm0, %v53_v31  ;;  %1223 = vmatprep.subr.mxu1 %v426_v44 }
  0x1d   :  { %1197 = vmatprep.mubr.msk.f32.mxu1 %vm67_vm0, %v54_v33  ;;  %1224 = vmatpush3.msra.mxu1 %v426_v44 }
  0x1e   :  { %1174 = vmatmul.mubr.msk.f32.gmra.mxu0 %vm67_vm0, %v39_v32  ;;  %1225 = vmatprep.subr.mxu1 %v425_v45 }
  0x1f   :  { %1176 = vmatprep.mubr.msk.f32.mxu0 %vm67_vm0, %v40_v34  ;;  %1226 = vmatpush3.msra.mxu1 %v425_v45 }
  0x20   :  { %1198 = vmatmul.mubr.msk.f32.gmra.mxu1 %vm67_vm0, %v55_v36  ;;  %1227 = vmatprep.subr.mxu1 %v424_v46 }
  0x21   :  { %1200 = vmatprep.mubr.msk.f32.mxu1 %vm67_vm0, %v56_v38  ;;  %1228 = vmatpush3.msra.mxu1 %v424_v46 }
  0x22   :  { %1177 = vmatmul.mubr.msk.f32.gmra.mxu0 %vm67_vm0, %v41_v37  ;;  %1229 = vmatprep.subr.mxu1 %v423_v47 }
  0x23   :  { %1230 = vmatpush3.msra.mxu1 %v423_v47  ;;  %1283 = vmatprep.subr.mxu0 %v716_v50 }
  0x24   :  { %1201 = vmatmul.mubr.msk.f32.gmra.mxu1 %vm67_vm0, %v57_v40  ;;  %1231 = vmatprep.subr.mxu1 %v422_v48 }
  0x25   :  { %1232 = vmatpush3.msra.mxu1 %v422_v48  ;;  %1284 = vmatpush3.msra.mxu0 %v716_v50 }
  0x26   :  { %1233 = vmatprep.subr.mxu1 %v421_v49  ;;  %1285 = vmatprep.subr.mxu0 %v715_v51 }
  0x27   :  { %1234 = vmatpush3.msra.mxu1 %v421_v49  ;;  %1286 = vmatpush3.msra.mxu0 %v715_v51 }
  0x28   :  { %1287 = vmatprep.subr.mxu0 %v714_v52 }
  0x29   :  { %1288 = vmatpush3.msra.mxu0 %v714_v52 }
  0x2a   :  { %1289 = vmatprep.subr.mxu0 %v713_v53 }
  0x2b   :  { %1290 = vmatpush3.msra.mxu0 %v713_v53 }
  0x2c   :  { %1291 = vmatprep.subr.mxu0 %v712_v54 }
  0x2d   :  { %1292 = vmatpush3.msra.mxu0 %v712_v54 }
  0x2e   :  { %1293 = vmatprep.subr.mxu0 %v711_v55 }
  0x2f   :  { %1294 = vmatpush3.msra.mxu0 %v711_v55 }
  0x30   :  { %1295 = vmatprep.subr.mxu0 %v710_v56 }
  0x31   :  { %1296 = vmatpush3.msra.mxu0 %v710_v56 }
  0x32   :  { %1297 = vmatprep.subr.mxu0 %v709_v57 }
  0x33   :  { %1298 = vmatpush3.msra.mxu0 %v709_v57 }
  0x34   :  { %1299 = vmatprep.subr.mxu0 %v708_v58 }
  0x35   :  { %1300 = vmatpush3.msra.mxu0 %v708_v58 }
  0x36   :  { %1301 = vmatprep.subr.mxu0 %v707_v59 }
  0x37   :  { %1302 = vmatpush3.msra.mxu0 %v707_v59 }
  0x38   :  { %1303 = vmatprep.subr.mxu0 %v706_v60 }
  0x39   :  { %1304 = vmatpush3.msra.mxu0 %v706_v60 }
  0x3a   :  { %1305 = vmatprep.subr.mxu0 %v705_v61 }
  0x3b   :  { %1306 = vmatpush3.msra.mxu0 %v705_v61 }
  0x3c   :  { %1307 = vmatprep.subr.mxu0 %v704_v62 }
  0x3d   :  { %1308 = vmatpush3.msra.mxu0 %v704_v62 }
  0xc6   :  { %v1157_v0 = vpop.f32.mrf.mxu0 }
  0xc7   :  { %v236_v1 = vadd.f32 %v1157_v0, %v1631_v63 }
  0xc8   :  { %v230_v2 = vpop.f32.mrf.mxu0  ;;  %v1635_v4 = vpop.f32.mrf.mxu1 }
  0xc9   :  { %v231_v3 = vadd.f32 %v1631_v63, %v230_v2  ;;  %v390_v8 = vmax.f32 %v236_v1, 0.0  ;;  %v316_v61 = vadd.f32 %v1635_v4, %v1631_v63 }
  0xca   :  { %v1160_v5 = vpop.f32.mrf.mxu0  ;;  %v310_v7 = vpop.f32.mrf.mxu1 }
  0xcb   :  { %v389_v6 = vmax.f32 %v231_v3, 0.0  ;;  %v246_v9 = vadd.f32 %v1160_v5, %v1631_v63  ;;  %v311_v51 = vadd.f32 %v1631_v63, %v310_v7  ;;  %v406_v2 = vmax.f32 %v316_v61, 0.0 }
  0xcc   :  { %v240_v10 = vpop.f32.mrf.mxu0  ;;  %v1639_v12 = vpop.f32.mrf.mxu1 }
  0xcd   :  { %v241_v11 = vadd.f32 %v1631_v63, %v240_v10  ;;  %1235 = vmatprep.mubr.f32.mxu1 %v389_v6  ;;  %v392_v16 = vmax.f32 %v246_v9, 0.0  ;;  %v405_v58 = vmax.f32 %v311_v51, 0.0  ;;  %v326_v3 = vadd.f32 %v1639_v12, %v1631_v63 }
  0xce   :  { %v1163_v13 = vpop.f32.mrf.mxu0  ;;  %1236 = vmatmul.mubr.f32.vlgmr.msra.gmra.mxu1 %v390_v8  ;;  %v320_v15 = vpop.f32.mrf.mxu1 }
  0xcf   :  { %v391_v14 = vmax.f32 %v241_v11, 0.0  ;;  %v256_v17 = vadd.f32 %v1163_v13, %v1631_v63  ;;  %v321_v59 = vadd.f32 %v1631_v63, %v320_v15  ;;  %v408_v8 = vmax.f32 %v326_v3, 0.0 }
  0xd0   :  { %v250_v18 = vpop.f32.mrf.mxu0  ;;  %v1643_v20 = vpop.f32.mrf.mxu1 }
  0xd1   :  { %v251_v19 = vadd.f32 %v1631_v63, %v250_v18  ;;  %1238 = vmatprep.mubr.f32.mxu1 %v391_v14  ;;  %v394_v23 = vmax.f32 %v256_v17, 0.0  ;;  %v407_v0 = vmax.f32 %v321_v59, 0.0  ;;  %v336_v4 = vadd.f32 %v1643_v20, %v1631_v63 }
  0xd2   :  { %v1166_v21 = vpop.f32.mrf.mxu0  ;;  %1239 = vmatmul.mubr.f32.gmra.mxu1 %v392_v16  ;;  %v330_v26 = vpop.f32.mrf.mxu1 }
  0xd3   :  { %v393_v22 = vmax.f32 %v251_v19, 0.0  ;;  %v266_v24 = vadd.f32 %v1166_v21, %v1631_v63  ;;  %v331_v1 = vadd.f32 %v1631_v63, %v330_v26  ;;  %v410_v13 = vmax.f32 %v336_v4, 0.0 }
  0xd4   :  { %v260_v25 = vpop.f32.mrf.mxu0  ;;  %v1190_v33 = vpop.f32.mrf.mxu1 }
  0xd5   :  { %v261_v27 = vadd.f32 %v1631_v63, %v260_v25  ;;  %1241 = vmatprep.mubr.f32.mxu1 %v393_v22  ;;  %v396_v30 = vmax.f32 %v266_v24, 0.0  ;;  %v409_v6 = vmax.f32 %v331_v1, 0.0  ;;  %v346_v14 = vadd.f32 %v1190_v33, %v1631_v63  ;;  %v703_v33 = vld [vmem:[%s1888_s5 + $0x10] sm:$0xff] }
  0xd6   :  { %v1169_v28 = vpop.f32.mrf.mxu0  ;;  %1242 = vmatmul.mubr.f32.gmra.mxu1 %v394_v23  ;;  %v340_v40 = vpop.f32.mrf.mxu1  ;;  %1309 = vmatprep.subr.mxu0 %v703_v33 }
  0xd7   :  { %v395_v29 = vmax.f32 %v261_v27, 0.0  ;;  %v276_v31 = vadd.f32 %v1169_v28, %v1631_v63  ;;  %v341_v7 = vadd.f32 %v1631_v63, %v340_v40  ;;  %v412_v17 = vmax.f32 %v346_v14, 0.0  ;;  %1310 = vmatpush3.msra.mxu0 %v703_v33 }
  0xd8   :  { %v270_v32 = vpop.f32.mrf.mxu0  ;;  %v1193_v47 = vpop.f32.mrf.mxu1 }
  0xd9   :  { %v271_v34 = vadd.f32 %v1631_v63, %v270_v32  ;;  %1244 = vmatprep.mubr.f32.mxu1 %v395_v29  ;;  %v398_v37 = vmax.f32 %v276_v31, 0.0  ;;  %v411_v10 = vmax.f32 %v341_v7, 0.0  ;;  %v356_v18 = vadd.f32 %v1193_v47, %v1631_v63 }
  0xda   :  { %v1172_v35 = vpop.f32.mrf.mxu0  ;;  %1245 = vmatmul.mubr.f32.gmra.mxu1 %v396_v30  ;;  %v350_v55 = vpop.f32.mrf.mxu1 }
  0xdb   :  { %v397_v36 = vmax.f32 %v271_v34, 0.0  ;;  %v286_v38 = vadd.f32 %v1172_v35, %v1631_v63  ;;  %v351_v11 = vadd.f32 %v1631_v63, %v350_v55  ;;  %v414_v22 = vmax.f32 %v356_v18, 0.0  ;;  %v702_v34 = vld [vmem:[%s1888_s5 + $0x8] sm:$0xff]  ;;  %v1686_v35 = vld [vmem:[%s1890_s4] ss:$0 sm:$0xff] }
  0xdc   :  { %v280_v39 = vpop.f32.mrf.mxu0  ;;  %v1196_v62 = vpop.f32.mrf.mxu1  ;;  %1311 = vmatprep.subr.mxu0 %v702_v34 }
  0xdd   :  { %v281_v41 = vadd.f32 %v1631_v63, %v280_v39  ;;  %1247 = vmatprep.mubr.f32.mxu1 %v397_v36  ;;  %v400_v44 = vmax.f32 %v286_v38, 0.0  ;;  %v413_v15 = vmax.f32 %v351_v11, 0.0  ;;  %v366_v23 = vadd.f32 %v1196_v62, %v1631_v63  ;;  %1312 = vmatpush3.msra.mxu0 %v702_v34 }
  0xde   :  { %v1175_v42 = vpop.f32.mrf.mxu0  ;;  %1248 = vmatmul.mubr.f32.gmra.mxu1 %v398_v37  ;;  %v360_v5 = vpop.f32.mrf.mxu1 }
  0xdf   :  { %v399_v43 = vmax.f32 %v281_v41, 0.0  ;;  %v296_v45 = vadd.f32 %v1175_v42, %v1631_v63  ;;  %v361_v16 = vadd.f32 %v1631_v63, %v360_v5  ;;  %v416_v27 = vmax.f32 %v366_v23, 0.0 }
  0xe0   :  { %v290_v46 = vpop.f32.mrf.mxu0  ;;  %v1199_v9 = vpop.f32.mrf.mxu1 }
  0xe1   :  { %v291_v48 = vadd.f32 %v1631_v63, %v290_v46  ;;  %1250 = vmatprep.mubr.f32.mxu1 %v399_v43  ;;  %v402_v52 = vmax.f32 %v296_v45, 0.0  ;;  %v415_v20 = vmax.f32 %v361_v16, 0.0  ;;  %v376_v28 = vadd.f32 %v1199_v9, %v1631_v63 }
  0xe2   :  { %v1178_v49 = vpop.f32.mrf.mxu0  ;;  %1251 = vmatmul.mubr.f32.gmra.mxu1 %v400_v44  ;;  %v370_v12 = vpop.f32.mrf.mxu1 }
  0xe3   :  { %v401_v50 = vmax.f32 %v291_v48, 0.0  ;;  %v306_v53 = vadd.f32 %v1178_v49, %v1631_v63  ;;  %v371_v21 = vadd.f32 %v1631_v63, %v370_v12  ;;  %v418_v30 = vmax.f32 %v376_v28, 0.0 }
  0xe4   :  { %v300_v54 = vpop.f32.mrf.mxu0  ;;  %v1202_v19 = vpop.f32.mrf.mxu1 }
  0xe5   :  { %v301_v56 = vadd.f32 %v1631_v63, %v300_v54  ;;  %1253 = vmatprep.mubr.f32.mxu1 %v401_v50  ;;  %v404_v60 = vmax.f32 %v306_v53, 0.0  ;;  %v417_v25 = vmax.f32 %v371_v21, 0.0  ;;  %v386_v31 = vadd.f32 %v1202_v19, %v1631_v63 }
  0xe6   :  { %1254 = vmatmul.mubr.f32.gmra.mxu1 %v402_v52  ;;  %v380_v24 = vpop.f32.mrf.mxu1 }
  0xe7   :  { %v403_v57 = vmax.f32 %v301_v56, 0.0  ;;  %v381_v26 = vadd.f32 %v1631_v63, %v380_v24  ;;  %v420_v32 = vmax.f32 %v386_v31, 0.0  ;;  %v701_v63 = vld [vmem:[%s1888_s5] sm:$0xff] }
  0xe8   :  { %1313 = vmatprep.subr.mxu0 %v701_v63 }
  0xe9   :  { %1256 = vmatprep.mubr.f32.mxu1 %v403_v57  ;;  %v419_v29 = vmax.f32 %v381_v26, 0.0  ;;  %1314 = vmatpush3.msra.mxu0 %v701_v63 }
  0xea   :  { %1257 = vmatmul.mubr.f32.gmra.mxu1 %v404_v60 }
  0xeb   :  { %1259 = vmatprep.mubr.f32.mxu1 %v405_v58 }
  0xee   :  { %1260 = vmatmul.mubr.f32.gmra.mxu1 %v406_v2 }
  0xef   :  { %1262 = vmatprep.mubr.f32.mxu1 %v407_v0 }
  0xf2   :  { %1263 = vmatmul.mubr.f32.gmra.mxu1 %v408_v8 }
  0xf3   :  { %1265 = vmatprep.mubr.f32.mxu1 %v409_v6 }
  0xf6   :  { %1266 = vmatmul.mubr.f32.gmra.mxu1 %v410_v13 }
  0xf7   :  { %1268 = vmatprep.mubr.f32.mxu1 %v411_v10 }
  0xfa   :  { %1269 = vmatmul.mubr.f32.gmra.mxu1 %v412_v17 }
  0xfb   :  { %1271 = vmatprep.mubr.f32.mxu1 %v413_v15 }
  0xfe   :  { %1272 = vmatmul.mubr.f32.gmra.mxu1 %v414_v22 }
  0xff   :  { %1274 = vmatprep.mubr.f32.mxu1 %v415_v20 }
 0x102   :  { %1275 = vmatmul.mubr.f32.gmra.mxu1 %v416_v27 }
 0x103   :  { %1277 = vmatprep.mubr.f32.mxu1 %v417_v25 }
 0x106   :  { %1278 = vmatmul.mubr.f32.gmra.mxu1 %v418_v30 }
 0x107   :  { %1280 = vmatprep.mubr.f32.mxu1 %v419_v29 }
 0x10a   :  { %1281 = vmatmul.mubr.f32.gmra.mxu1 %v420_v32 }
 0x18e   :  { %v1237_v36 = vpop.f32.mrf.mxu1 }
 0x18f   :  { %v516_v37 = vadd.f32 %v1237_v36, %v1686_v35 }
 0x190   :  { %v510_v38 = vpop.f32.mrf.mxu1 }
 0x191   :  { %v511_v39 = vadd.f32 %v1686_v35, %v510_v38  ;;  %v670_v42 = vmax.f32 %v516_v37, 0.0 }
 0x192   :  { %v1240_v40 = vpop.f32.mrf.mxu1 }
 0x193   :  { %v669_v41 = vmax.f32 %v511_v39, 0.0  ;;  %v526_v43 = vadd.f32 %v1240_v40, %v1686_v35 }
 0x194   :  { %v520_v44 = vpop.f32.mrf.mxu1 }
 0x195   :  { %v521_v45 = vadd.f32 %v1686_v35, %v520_v44  ;;  %1315 = vmatprep.mubr.f32.mxu0 %v669_v41  ;;  %v672_v48 = vmax.f32 %v526_v43, 0.0 }
 0x196   :  { %v1243_v46 = vpop.f32.mrf.mxu1  ;;  %1316 = vmatmul.mubr.f32.vlgmr.msra.gmra.mxu0 %v670_v42 }
 0x197   :  { %v671_v47 = vmax.f32 %v521_v45, 0.0  ;;  %v536_v49 = vadd.f32 %v1243_v46, %v1686_v35 }
 0x198   :  { %v530_v50 = vpop.f32.mrf.mxu1 }
 0x199   :  { %v531_v51 = vadd.f32 %v1686_v35, %v530_v50  ;;  %1318 = vmatprep.mubr.f32.mxu0 %v671_v47  ;;  %v674_v54 = vmax.f32 %v536_v49, 0.0 }
 0x19a   :  { %v1246_v52 = vpop.f32.mrf.mxu1  ;;  %1319 = vmatmul.mubr.f32.gmra.mxu0 %v672_v48 }
 0x19b   :  { %v673_v53 = vmax.f32 %v531_v51, 0.0  ;;  %v546_v55 = vadd.f32 %v1246_v52, %v1686_v35 }
 0x19c   :  { %v540_v56 = vpop.f32.mrf.mxu1 }
 0x19d   :  { %v541_v57 = vadd.f32 %v1686_v35, %v540_v56  ;;  %1321 = vmatprep.mubr.f32.mxu0 %v673_v53  ;;  %v676_v60 = vmax.f32 %v546_v55, 0.0 }
 0x19e   :  { %v1249_v58 = vpop.f32.mrf.mxu1  ;;  %1322 = vmatmul.mubr.f32.gmra.mxu0 %v674_v54 }
 0x19f   :  { %v675_v59 = vmax.f32 %v541_v57, 0.0  ;;  %v556_v61 = vadd.f32 %v1249_v58, %v1686_v35 }
 0x1a0   :  { %v550_v62 = vpop.f32.mrf.mxu1 }
 0x1a1   :  { %v551_v0 = vadd.f32 %v1686_v35, %v550_v62  ;;  %1324 = vmatprep.mubr.f32.mxu0 %v675_v59  ;;  %v678_v3 = vmax.f32 %v556_v61, 0.0 }
 0x1a2   :  { %v1252_v1 = vpop.f32.mrf.mxu1  ;;  %1325 = vmatmul.mubr.f32.gmra.mxu0 %v676_v60 }
 0x1a3   :  { %v677_v2 = vmax.f32 %v551_v0, 0.0  ;;  %v566_v5 = vadd.f32 %v1252_v1, %v1686_v35 }
 0x1a4   :  { %v560_v6 = vpop.f32.mrf.mxu1 }
 0x1a5   :  { %v561_v7 = vadd.f32 %v1686_v35, %v560_v6  ;;  %1327 = vmatprep.mubr.f32.mxu0 %v677_v2  ;;  %v680_v9 = vmax.f32 %v566_v5, 0.0 }
 0x1a6   :  { %v1255_v8 = vpop.f32.mrf.mxu1  ;;  %1328 = vmatmul.mubr.f32.gmra.mxu0 %v678_v3 }
 0x1a7   :  { %v679_v4 = vmax.f32 %v561_v7, 0.0  ;;  %v576_v10 = vadd.f32 %v1255_v8, %v1686_v35  ;;  %v1723_v7 = vld [vmem:[%s1891_s6] ss:$0 sm:$0xff] }
 0x1a8   :  { %v570_v11 = vpop.f32.mrf.mxu1 }
 0x1a9   :  { %v571_v13 = vadd.f32 %v1686_v35, %v570_v11  ;;  %1330 = vmatprep.mubr.f32.mxu0 %v679_v4  ;;  %v682_v15 = vmax.f32 %v576_v10, 0.0 }
 0x1aa   :  { %v1258_v14 = vpop.f32.mrf.mxu1  ;;  %1331 = vmatmul.mubr.f32.gmra.mxu0 %v680_v9 }
 0x1ab   :  { %v681_v12 = vmax.f32 %v571_v13, 0.0  ;;  %v586_v16 = vadd.f32 %v1258_v14, %v1686_v35 }
 0x1ac   :  { %v580_v17 = vpop.f32.mrf.mxu1 }
 0x1ad   :  { %v581_v18 = vadd.f32 %v1686_v35, %v580_v17  ;;  %1333 = vmatprep.mubr.f32.mxu0 %v681_v12  ;;  %v684_v21 = vmax.f32 %v586_v16, 0.0 }
 0x1ae   :  { %v1261_v19 = vpop.f32.mrf.mxu1  ;;  %1334 = vmatmul.mubr.f32.gmra.mxu0 %v682_v15 }
 0x1af   :  { %v683_v20 = vmax.f32 %v581_v18, 0.0  ;;  %v596_v22 = vadd.f32 %v1261_v19, %v1686_v35 }
 0x1b0   :  { %v590_v23 = vpop.f32.mrf.mxu1 }
 0x1b1   :  { %v591_v24 = vadd.f32 %v1686_v35, %v590_v23  ;;  %1336 = vmatprep.mubr.f32.mxu0 %v683_v20  ;;  %v686_v27 = vmax.f32 %v596_v22, 0.0 }
 0x1b2   :  { %v1264_v25 = vpop.f32.mrf.mxu1  ;;  %1337 = vmatmul.mubr.f32.gmra.mxu0 %v684_v21 }
 0x1b3   :  { %v685_v26 = vmax.f32 %v591_v24, 0.0  ;;  %v606_v28 = vadd.f32 %v1264_v25, %v1686_v35 }
 0x1b4   :  { %v600_v29 = vpop.f32.mrf.mxu1 }
 0x1b5   :  { %v601_v30 = vadd.f32 %v1686_v35, %v600_v29  ;;  %1339 = vmatprep.mubr.f32.mxu0 %v685_v26  ;;  %v688_v33 = vmax.f32 %v606_v28, 0.0 }
 0x1b6   :  { %v1267_v31 = vpop.f32.mrf.mxu1  ;;  %1340 = vmatmul.mubr.f32.gmra.mxu0 %v686_v27 }
 0x1b7   :  { %v687_v32 = vmax.f32 %v601_v30, 0.0  ;;  %v616_v34 = vadd.f32 %v1267_v31, %v1686_v35 }
 0x1b8   :  { %v610_v63 = vpop.f32.mrf.mxu1 }
 0x1b9   :  { %v611_v36 = vadd.f32 %v1686_v35, %v610_v63  ;;  %1342 = vmatprep.mubr.f32.mxu0 %v687_v32  ;;  %v690_v39 = vmax.f32 %v616_v34, 0.0 }
 0x1ba   :  { %v1270_v37 = vpop.f32.mrf.mxu1  ;;  %1343 = vmatmul.mubr.f32.gmra.mxu0 %v688_v33 }
 0x1bb   :  { %v689_v38 = vmax.f32 %v611_v36, 0.0  ;;  %v626_v40 = vadd.f32 %v1270_v37, %v1686_v35 }
 0x1bc   :  { %v620_v41 = vpop.f32.mrf.mxu1 }
 0x1bd   :  { %v621_v42 = vadd.f32 %v1686_v35, %v620_v41  ;;  %1345 = vmatprep.mubr.f32.mxu0 %v689_v38  ;;  %v692_v45 = vmax.f32 %v626_v40, 0.0 }
 0x1be   :  { %v1273_v43 = vpop.f32.mrf.mxu1  ;;  %1346 = vmatmul.mubr.f32.gmra.mxu0 %v690_v39 }
 0x1bf   :  { %v691_v44 = vmax.f32 %v621_v42, 0.0  ;;  %v636_v46 = vadd.f32 %v1273_v43, %v1686_v35 }
 0x1c0   :  { %v630_v47 = vpop.f32.mrf.mxu1 }
 0x1c1   :  { %v631_v48 = vadd.f32 %v1686_v35, %v630_v47  ;;  %1348 = vmatprep.mubr.f32.mxu0 %v691_v44  ;;  %v694_v51 = vmax.f32 %v636_v46, 0.0 }
 0x1c2   :  { %v1276_v49 = vpop.f32.mrf.mxu1  ;;  %1349 = vmatmul.mubr.f32.gmra.mxu0 %v692_v45 }
 0x1c3   :  { %v693_v50 = vmax.f32 %v631_v48, 0.0  ;;  %v646_v52 = vadd.f32 %v1276_v49, %v1686_v35 }
 0x1c4   :  { %v640_v53 = vpop.f32.mrf.mxu1 }
 0x1c5   :  { %v641_v54 = vadd.f32 %v1686_v35, %v640_v53  ;;  %1351 = vmatprep.mubr.f32.mxu0 %v693_v50  ;;  %v696_v57 = vmax.f32 %v646_v52, 0.0 }
 0x1c6   :  { %v1279_v55 = vpop.f32.mrf.mxu1  ;;  %1352 = vmatmul.mubr.f32.gmra.mxu0 %v694_v51 }
 0x1c7   :  { %v695_v56 = vmax.f32 %v641_v54, 0.0  ;;  %v656_v58 = vadd.f32 %v1279_v55, %v1686_v35 }
 0x1c8   :  { %v650_v59 = vpop.f32.mrf.mxu1 }
 0x1c9   :  { %v651_v60 = vadd.f32 %v1686_v35, %v650_v59  ;;  %1354 = vmatprep.mubr.f32.mxu0 %v695_v56  ;;  %v698_v0 = vmax.f32 %v656_v58, 0.0 }
 0x1ca   :  { %v1282_v61 = vpop.f32.mrf.mxu1  ;;  %1355 = vmatmul.mubr.f32.gmra.mxu0 %v696_v57 }
 0x1cb   :  { %v697_v62 = vmax.f32 %v651_v60, 0.0  ;;  %v666_v1 = vadd.f32 %v1282_v61, %v1686_v35 }
 0x1cc   :  { %v660_v2 = vpop.f32.mrf.mxu1 }
 0x1cd   :  { %v661_v3 = vadd.f32 %v1686_v35, %v660_v2  ;;  %1357 = vmatprep.mubr.f32.mxu0 %v697_v62  ;;  %v700_v6 = vmax.f32 %v666_v1, 0.0 }
 0x1ce   :  { %1358 = vmatmul.mubr.f32.gmra.mxu0 %v698_v0 }
 0x1cf   :  { %v699_v5 = vmax.f32 %v661_v3, 0.0 }
 0x1d1   :  { %1360 = vmatprep.mubr.f32.mxu0 %v699_v5 }
 0x1d2   :  { %1361 = vmatmul.mubr.f32.gmra.mxu0 %v700_v6 }
 0x256   :  { %v1317_v8 = vpop.f32.mrf.mxu0 }
 0x257   :  { %v796_v4 = vadd.f32 %v1317_v8, %v1723_v7 }
 0x258   :  { %v790_v9 = vpop.f32.mrf.mxu0 }
 0x259   :  { %951 = vst.msk [vmem:[%s1892_s7 + $0x8] sm:$0xff] %vm949_vm1, %v796_v4  ;;  %v791_v35 = vadd.f32 %v1723_v7, %v790_v9 }
 0x25a   :  { %v1320_v10 = vpop.f32.mrf.mxu0 }
 0x25b   :  { %950 = vst.msk [vmem:[%s1892_s7] sm:$0xff] %vm949_vm1, %v791_v35  ;;  %v806_v11 = vadd.f32 %v1320_v10, %v1723_v7 }
 0x25c   :  { %v800_v13 = vpop.f32.mrf.mxu0 }
 0x25d   :  { %953 = vst.msk [vmem:[%s1892_s7 + $0x18] sm:$0xff] %vm949_vm1, %v806_v11  ;;  %v801_v14 = vadd.f32 %v1723_v7, %v800_v13 }
 0x25e   :  { %v1323_v12 = vpop.f32.mrf.mxu0 }
 0x25f   :  { %952 = vst.msk [vmem:[%s1892_s7 + $0x10] sm:$0xff] %vm949_vm1, %v801_v14  ;;  %v816_v15 = vadd.f32 %v1323_v12, %v1723_v7 }
 0x260   :  { %v810_v16 = vpop.f32.mrf.mxu0 }
 0x261   :  { %955 = vst.msk [vmem:[%s1892_s7 + $0x28] sm:$0xff] %vm949_vm1, %v816_v15  ;;  %v811_v17 = vadd.f32 %v1723_v7, %v810_v16 }
 0x262   :  { %v1326_v18 = vpop.f32.mrf.mxu0 }
 0x263   :  { %954 = vst.msk [vmem:[%s1892_s7 + $0x20] sm:$0xff] %vm949_vm1, %v811_v17  ;;  %v826_v19 = vadd.f32 %v1326_v18, %v1723_v7 }
 0x264   :  { %v820_v20 = vpop.f32.mrf.mxu0 }
 0x265   :  { %957 = vst.msk [vmem:[%s1892_s7 + $0x38] sm:$0xff] %vm949_vm1, %v826_v19  ;;  %v821_v21 = vadd.f32 %v1723_v7, %v820_v20 }
 0x266   :  { %v1329_v22 = vpop.f32.mrf.mxu0 }
 0x267   :  { %956 = vst.msk [vmem:[%s1892_s7 + $0x30] sm:$0xff] %vm949_vm1, %v821_v21  ;;  %v836_v23 = vadd.f32 %v1329_v22, %v1723_v7 }
 0x268   :  { %v830_v24 = vpop.f32.mrf.mxu0 }
 0x269   :  { %959 = vst.msk [vmem:[%s1892_s7 + $0x48] sm:$0xff] %vm949_vm1, %v836_v23  ;;  %v831_v25 = vadd.f32 %v1723_v7, %v830_v24 }
 0x26a   :  { %v1332_v26 = vpop.f32.mrf.mxu0 }
 0x26b   :  { %958 = vst.msk [vmem:[%s1892_s7 + $0x40] sm:$0xff] %vm949_vm1, %v831_v25  ;;  %v846_v27 = vadd.f32 %v1332_v26, %v1723_v7 }
 0x26c   :  { %v840_v28 = vpop.f32.mrf.mxu0 }
 0x26d   :  { %961 = vst.msk [vmem:[%s1892_s7 + $0x58] sm:$0xff] %vm949_vm1, %v846_v27  ;;  %v841_v29 = vadd.f32 %v1723_v7, %v840_v28 }
 0x26e   :  { %v1335_v30 = vpop.f32.mrf.mxu0 }
 0x26f   :  { %960 = vst.msk [vmem:[%s1892_s7 + $0x50] sm:$0xff] %vm949_vm1, %v841_v29  ;;  %v856_v31 = vadd.f32 %v1335_v30, %v1723_v7 }
 0x270   :  { %v850_v32 = vpop.f32.mrf.mxu0 }
 0x271   :  { %963 = vst.msk [vmem:[%s1892_s7 + $0x68] sm:$0xff] %vm949_vm1, %v856_v31  ;;  %v851_v33 = vadd.f32 %v1723_v7, %v850_v32 }
 0x272   :  { %v1338_v34 = vpop.f32.mrf.mxu0 }
 0x273   :  { %962 = vst.msk [vmem:[%s1892_s7 + $0x60] sm:$0xff] %vm949_vm1, %v851_v33  ;;  %v866_v63 = vadd.f32 %v1338_v34, %v1723_v7 }
 0x274   :  { %v860_v36 = vpop.f32.mrf.mxu0 }
 0x275   :  { %965 = vst.msk [vmem:[%s1892_s7 + $0x78] sm:$0xff] %vm949_vm1, %v866_v63  ;;  %v861_v37 = vadd.f32 %v1723_v7, %v860_v36 }
 0x276   :  { %v1341_v38 = vpop.f32.mrf.mxu0 }
 0x277   :  { %964 = vst.msk [vmem:[%s1892_s7 + $0x70] sm:$0xff] %vm949_vm1, %v861_v37  ;;  %v876_v39 = vadd.f32 %v1341_v38, %v1723_v7 }
 0x278   :  { %v870_v40 = vpop.f32.mrf.mxu0 }
 0x279   :  { %967 = vst.msk [vmem:[%s1892_s7 + $0x88] sm:$0xff] %vm949_vm1, %v876_v39  ;;  %v871_v41 = vadd.f32 %v1723_v7, %v870_v40 }
 0x27a   :  { %v1344_v42 = vpop.f32.mrf.mxu0 }
 0x27b   :  { %966 = vst.msk [vmem:[%s1892_s7 + $0x80] sm:$0xff] %vm949_vm1, %v871_v41  ;;  %v886_v43 = vadd.f32 %v1344_v42, %v1723_v7 }
 0x27c   :  { %v880_v44 = vpop.f32.mrf.mxu0 }
 0x27d   :  { %969 = vst.msk [vmem:[%s1892_s7 + $0x98] sm:$0xff] %vm949_vm1, %v886_v43  ;;  %v881_v45 = vadd.f32 %v1723_v7, %v880_v44 }
 0x27e   :  { %v1347_v46 = vpop.f32.mrf.mxu0 }
 0x27f   :  { %968 = vst.msk [vmem:[%s1892_s7 + $0x90] sm:$0xff] %vm949_vm1, %v881_v45  ;;  %v896_v47 = vadd.f32 %v1347_v46, %v1723_v7 }
 0x280   :  { %v890_v48 = vpop.f32.mrf.mxu0 }
 0x281   :  { %971 = vst.msk [vmem:[%s1892_s7 + $0xa8] sm:$0xff] %vm949_vm1, %v896_v47  ;;  %v891_v49 = vadd.f32 %v1723_v7, %v890_v48 }
 0x282   :  { %v1350_v50 = vpop.f32.mrf.mxu0 }
 0x283   :  { %970 = vst.msk [vmem:[%s1892_s7 + $0xa0] sm:$0xff] %vm949_vm1, %v891_v49  ;;  %v906_v51 = vadd.f32 %v1350_v50, %v1723_v7 }
 0x284   :  { %v900_v52 = vpop.f32.mrf.mxu0 }
 0x285   :  { %973 = vst.msk [vmem:[%s1892_s7 + $0xb8] sm:$0xff] %vm949_vm1, %v906_v51  ;;  %v901_v53 = vadd.f32 %v1723_v7, %v900_v52 }
 0x286   :  { %v1353_v54 = vpop.f32.mrf.mxu0 }
 0x287   :  { %972 = vst.msk [vmem:[%s1892_s7 + $0xb0] sm:$0xff] %vm949_vm1, %v901_v53  ;;  %v916_v55 = vadd.f32 %v1353_v54, %v1723_v7 }
 0x288   :  { %v910_v56 = vpop.f32.mrf.mxu0 }
 0x289   :  { %975 = vst.msk [vmem:[%s1892_s7 + $0xc8] sm:$0xff] %vm949_vm1, %v916_v55  ;;  %v911_v57 = vadd.f32 %v1723_v7, %v910_v56 }
 0x28a   :  { %v1356_v58 = vpop.f32.mrf.mxu0 }
 0x28b   :  { %974 = vst.msk [vmem:[%s1892_s7 + $0xc0] sm:$0xff] %vm949_vm1, %v911_v57  ;;  %v926_v59 = vadd.f32 %v1356_v58, %v1723_v7 }
 0x28c   :  { %v920_v60 = vpop.f32.mrf.mxu0 }
 0x28d   :  { %977 = vst.msk [vmem:[%s1892_s7 + $0xd8] sm:$0xff] %vm949_vm1, %v926_v59  ;;  %v921_v61 = vadd.f32 %v1723_v7, %v920_v60 }
 0x28e   :  { %v1359_v62 = vpop.f32.mrf.mxu0 }
 0x28f   :  { %976 = vst.msk [vmem:[%s1892_s7 + $0xd0] sm:$0xff] %vm949_vm1, %v921_v61  ;;  %v936_v0 = vadd.f32 %v1359_v62, %v1723_v7 }
 0x290   :  { %v930_v1 = vpop.f32.mrf.mxu0 }
 0x291   :  { %979 = vst.msk [vmem:[%s1892_s7 + $0xe8] sm:$0xff] %vm949_vm1, %v936_v0  ;;  %v931_v2 = vadd.f32 %v1723_v7, %v930_v1 }
 0x292   :  { %v1362_v3 = vpop.f32.mrf.mxu0 }
 0x293   :  { %978 = vst.msk [vmem:[%s1892_s7 + $0xe0] sm:$0xff] %vm949_vm1, %v931_v2  ;;  %v946_v5 = vadd.f32 %v1362_v3, %v1723_v7 }
 0x294   :  { %v940_v6 = vpop.f32.mrf.mxu0 }
 0x295   :  { %981 = vst.msk [vmem:[%s1892_s7 + $0xf8] sm:$0xff] %vm949_vm1, %v946_v5  ;;  %v941_v8 = vadd.f32 %v1723_v7, %v940_v6 }
 0x297   :  { %980 = vst.msk [vmem:[%s1892_s7 + $0xf0] sm:$0xff] %vm949_vm1, %v941_v8 }

</bundles_post_ra>
